<compile_context>
chip_gen: v7x
topology: tpu7x:2x2x1
jax: 0.10.0
libtpu: 0.0.40
codegen_flags: <defaults>
</compile_context>

<pallas_src>
import functools

import jax
import jax.numpy as jnp
from jax.experimental import pallas as pl
from jax.experimental.pallas import tpu as pltpu

_LN_EPS = 1e-6                      # BLIP ViT uses nn.LayerNorm(eps=1e-6)
_VMEM_LIMIT = 32 * 1024 * 1024      # safe on v5e/v6e/v7x


def _tile(dim, target, align):
    """Largest tile <= target that divides dim and is a multiple of align.
    Falls back to the full dim (always legal for BlockSpec)."""
    if dim <= target:
        return dim
    t = (target // align) * align
    while t >= align:
        if dim % t == 0:
            return t
        t -= align
    return dim


def _cparams(*sem):
    return pltpu.CompilerParams(dimension_semantics=sem,
                                vmem_limit_bytes=_VMEM_LIMIT)


# --------------------------------------------------------------------------
# Tiled matmul (+ bias, + optional residual epilogue).  Used for the patch
# embedding and the attention output projection (with residual fused in).
# --------------------------------------------------------------------------

def matmul_fused(x, w, b, residual=None, *, out_dtype=jnp.float32,
                 tm=256, tn=512, tk=512):
    M, K = x.shape
    _, N = w.shape
    tm = _tile(M, tm, 8)
    tn = _tile(N, tn, 128)
    tk = _tile(K, tk, 128)
    nk = K // tk
    grid = (M // tm, N // tn, nk)

    def kernel(*refs):
        if residual is not None:
            x_ref, w_ref, b_ref, r_ref, o_ref, acc_ref = refs
        else:
            x_ref, w_ref, b_ref, o_ref, acc_ref = refs
            r_ref = None
        k = pl.program_id(2)

        @pl.when(k == 0)
        def _():
            acc_ref[...] = jnp.zeros_like(acc_ref)

        acc_ref[...] += jnp.dot(x_ref[...].astype(jnp.bfloat16), w_ref[...],
                                preferred_element_type=jnp.float32)

        @pl.when(k == nk - 1)
        def _():
            y = acc_ref[...] + b_ref[...].astype(jnp.float32)
            if r_ref is not None:
                y = y + r_ref[...].astype(jnp.float32)
            o_ref[...] = y.astype(o_ref.dtype)

    in_specs = [pl.BlockSpec((tm, tk), lambda i, j, k: (i, k)),
                pl.BlockSpec((tk, tn), lambda i, j, k: (k, j)),
                pl.BlockSpec((1, tn), lambda i, j, k: (0, j))]
    args = [x, w, b.reshape(1, N)]
    if residual is not None:
        in_specs.append(pl.BlockSpec((tm, tn), lambda i, j, k: (i, j)))
        args.append(residual)

    bytes_acc = (x.size * x.dtype.itemsize + w.size * w.dtype.itemsize
                 + M * N * 4 + (M * N * 4 if residual is not None else 0))
    return pl.pallas_call(
        kernel,
        grid=grid,
        out_shape=jax.ShapeDtypeStruct((M, N), out_dtype),
        in_specs=in_specs,
        out_specs=pl.BlockSpec((tm, tn), lambda i, j, k: (i, j)),
        scratch_shapes=[pltpu.VMEM((tm, tn), jnp.float32)],
        compiler_params=_cparams("parallel", "parallel", "arbitrary"),
        cost_estimate=pl.CostEstimate(flops=2 * M * K * N, transcendentals=0,
                                      bytes_accessed=int(bytes_acc)),
    )(*args)


# --------------------------------------------------------------------------
# Fused LayerNorm + matmul (+ optional L2-normalize epilogue).
# K (= hidden) is kept whole so the LN statistics are exact per row tile.
# Used for LN1->QKV and for final-LN->vision_proj->F.normalize.
# --------------------------------------------------------------------------

def _ln_matmul_kernel(x_ref, g_ref, bt_ref, w_ref, bias_ref, o_ref, *,
                      eps, l2norm):
    x = x_ref[...].astype(jnp.float32)
    mu = jnp.mean(x, axis=-1, keepdims=True)
    xc = x - mu
    var = jnp.mean(xc * xc, axis=-1, keepdims=True)
    xn = xc * jax.lax.rsqrt(var + eps) * g_ref[...] + bt_ref[...]
    y = jnp.dot(xn.astype(jnp.bfloat16), w_ref[...],
                preferred_element_type=jnp.float32)
    y = y + bias_ref[...].astype(jnp.float32)
    if l2norm:
        # F.normalize(dim=-1): x / max(||x||, 1e-12) via EUP rsqrt
        y = y * jax.lax.rsqrt(jnp.maximum(jnp.sum(y * y, axis=-1, keepdims=True),
                                          1e-24))
    o_ref[...] = y.astype(o_ref.dtype)


def ln_matmul(x, g, bt, w, bias, *, l2norm=False, out_dtype=jnp.bfloat16,
              tm=256, tn=512):
    M, D = x.shape
    _, N = w.shape
    tm = _tile(M, tm, 8)
    tn = N if l2norm else _tile(N, tn, 128)   # l2norm needs the whole row
    grid = (M // tm, N // tn)
    kernel = functools.partial(_ln_matmul_kernel, eps=_LN_EPS, l2norm=l2norm)
    return pl.pallas_call(
        kernel,
        grid=grid,
        out_shape=jax.ShapeDtypeStruct((M, N), out_dtype),
        in_specs=[pl.BlockSpec((tm, D), lambda i, j: (i, 0)),
                  pl.BlockSpec((1, D), lambda i, j: (0, 0)),
                  pl.BlockSpec((1, D), lambda i, j: (0, 0)),
                  pl.BlockSpec((D, tn), lambda i, j: (0, j)),
                  pl.BlockSpec((1, tn), lambda i, j: (0, j))],
        out_specs=pl.BlockSpec((tm, tn), lambda i, j: (i, j)),
        compiler_params=_cparams("parallel", "parallel"),
        cost_estimate=pl.CostEstimate(flops=2 * M * D * N, transcendentals=M,
                                      bytes_accessed=int(x.size * 4 + D * N * 2
                                                         + M * N * 2)),
    )(x, g.reshape(1, D), bt.reshape(1, D), w, bias.reshape(1, N))


# --------------------------------------------------------------------------
# Attention: one grid step per batch element, all heads processed inside the
# kernel from the fused (S, 3D) QKV tile -> lane-dense (S, D) output store.
# No HBM-level head reshapes/transposes.
# --------------------------------------------------------------------------

def _attn_kernel(qkv_ref, o_ref, *, num_heads, head_dim, seq_valid, scale):
    qkv = qkv_ref[0]                                   # (S_pad, 3D) bf16
    S = qkv.shape[0]
    D = num_heads * head_dim
    need_mask = seq_valid < S
    if need_mask:
        col = jax.lax.broadcasted_iota(jnp.int32, (S, S), 1)
        key_valid = col < seq_valid                    # mask padded keys
    outs = []
    for h in range(num_heads):                         # static unrolled loop
        q = qkv[:, h * head_dim:(h + 1) * head_dim]
        k = qkv[:, D + h * head_dim:D + (h + 1) * head_dim]
        v = qkv[:, 2 * D + h * head_dim:2 * D + (h + 1) * head_dim]
        s = jax.lax.dot_general(q, k, (((1,), (1,)), ((), ())),
                                preferred_element_type=jnp.float32) * scale
        if need_mask:
            s = jnp.where(key_valid, s, -1e30)
        m = jnp.max(s, axis=-1, keepdims=True)
        p = jnp.exp(s - m)
        denom = jnp.sum(p, axis=-1, keepdims=True)
        p = p * pl.reciprocal(denom, approx=True)      # EUP, not VALU divide
        outs.append(jnp.dot(p.astype(jnp.bfloat16), v,
                            preferred_element_type=jnp.float32))
    o_ref[0] = jnp.concatenate(outs, axis=-1).astype(o_ref.dtype)


def attention(qkv, *, num_heads, seq_valid, out_dtype=jnp.bfloat16):
    B, S_pad, threeD = qkv.shape
    D = threeD // 3
    Dh = D // num_heads
    scale = 1.0 / float(Dh) ** 0.5
    kernel = functools.partial(_attn_kernel, num_heads=num_heads, head_dim=Dh,
                               seq_valid=seq_valid, scale=scale)
    return pl.pallas_call(
        kernel,
        grid=(B,),
        out_shape=jax.ShapeDtypeStruct((B, S_pad, D), out_dtype),
        in_specs=[pl.BlockSpec((1, S_pad, threeD), lambda b: (b, 0, 0))],
        out_specs=pl.BlockSpec((1, S_pad, D), lambda b: (b, 0, 0)),
        compiler_params=_cparams("parallel"),
    )(qkv)


# --------------------------------------------------------------------------
# Fused MLP block: LN2 -> fc1 -> GELU -> fc2 -> + bias -> + residual.
# Hidden activations never touch HBM: grid = (token tiles, hidden tiles),
# LN(x) is cached in VMEM scratch at j==0, fc2 partials accumulate in VMEM.
# --------------------------------------------------------------------------

def _mlp_kernel(x_ref, g_ref, bt_ref, w1_ref, b1_ref, w2_ref, b2_ref,
                o_ref, acc_ref, xn_ref, *, nj, eps):
    j = pl.program_id(1)

    @pl.when(j == 0)
    def _():
        x = x_ref[...].astype(jnp.float32)
        mu = jnp.mean(x, axis=-1, keepdims=True)
        xc = x - mu
        var = jnp.mean(xc * xc, axis=-1, keepdims=True)
        xn = xc * jax.lax.rsqrt(var + eps) * g_ref[...] + bt_ref[...]
        xn_ref[...] = xn.astype(jnp.bfloat16)
        acc_ref[...] = jnp.zeros_like(acc_ref)

    h = jnp.dot(xn_ref[...], w1_ref[...], preferred_element_type=jnp.float32)
    # TODO(synk): timm/BLIP GELU is erf-based; tanh approximation used here.
    h = jax.nn.gelu(h + b1_ref[...].astype(jnp.float32))
    acc_ref[...] += jnp.dot(h.astype(jnp.bfloat16), w2_ref[...],
                            preferred_element_type=jnp.float32)

    @pl.when(j == nj - 1)
    def _():
        o_ref[...] = (x_ref[...].astype(jnp.float32) + acc_ref[...]
                      + b2_ref[...].astype(jnp.float32)).astype(o_ref.dtype)


def mlp_block(x, g, bt, w1, b1, w2, b2, *, tm=256, th=512):
    M, D = x.shape
    _, Hh = w1.shape
    tm = _tile(M, tm, 8)
    th = _tile(Hh, th, 128)
    nj = Hh // th
    grid = (M // tm, nj)
    kernel = functools.partial(_mlp_kernel, nj=nj, eps=_LN_EPS)
    return pl.pallas_call(
        kernel,
        grid=grid,
        out_shape=jax.ShapeDtypeStruct((M, D), jnp.float32),
        in_specs=[pl.BlockSpec((tm, D), lambda i, j: (i, 0)),
                  pl.BlockSpec((1, D), lambda i, j: (0, 0)),
                  pl.BlockSpec((1, D), lambda i, j: (0, 0)),
                  pl.BlockSpec((D, th), lambda i, j: (0, j)),
                  pl.BlockSpec((1, th), lambda i, j: (0, j)),
                  pl.BlockSpec((th, D), lambda i, j: (j, 0)),
                  pl.BlockSpec((1, D), lambda i, j: (0, 0))],
        out_specs=pl.BlockSpec((tm, D), lambda i, j: (i, 0)),
        scratch_shapes=[pltpu.VMEM((tm, D), jnp.float32),
                        pltpu.VMEM((tm, D), jnp.bfloat16)],
        compiler_params=_cparams("parallel", "arbitrary"),
        cost_estimate=pl.CostEstimate(flops=4 * M * D * Hh,
                                      transcendentals=M * Hh,
                                      bytes_accessed=int(2 * M * D * 4
                                                         + 2 * D * Hh * 2)),
    )(x, g.reshape(1, D), bt.reshape(1, D), w1, b1.reshape(1, Hh),
      w2, b2.reshape(1, D))


# --------------------------------------------------------------------------
# Symmetric InfoNCE loss. Target L2-normalize fused in; text->image logsumexp
# uses an axis=0 reduction (no in-kernel transpose of the similarity tile).
# --------------------------------------------------------------------------

def _clip_loss_kernel(q_ref, t_ref, o_ref, *, inv_temp):
    q = q_ref[...].astype(jnp.float32)
    t = t_ref[...].astype(jnp.float32)
    t = t * jax.lax.rsqrt(jnp.maximum(jnp.sum(t * t, axis=-1, keepdims=True),
                                      1e-24))                    # F.normalize
    sims = jax.lax.dot_general(q, t, (((1,), (1,)), ((), ())),
                               preferred_element_type=jnp.float32) * inv_temp
    B = sims.shape[0]
    rows = jax.lax.broadcasted_iota(jnp.int32, (B, B), 0)
    cols = jax.lax.broadcasted_iota(jnp.int32, (B, B), 1)
    diag = jnp.sum(jnp.where(rows == cols, sims, 0.0))
    m_r = jnp.max(sims, axis=-1, keepdims=True)                  # image->text
    lse_r = m_r + jnp.log(jnp.sum(jnp.exp(sims - m_r), axis=-1, keepdims=True))
    m_c = jnp.max(sims, axis=0, keepdims=True)                   # text->image
    lse_c = m_c + jnp.log(jnp.sum(jnp.exp(sims - m_c), axis=0, keepdims=True))
    loss = 0.5 * ((jnp.sum(lse_r) - diag) + (jnp.sum(lse_c) - diag)) / B
    o_ref[...] = jnp.full((1, 1), loss, jnp.float32)             # layout-safe


def clip_loss(query_feat, tar_feat, temp):
    B, E = query_feat.shape
    return pl.pallas_call(
        functools.partial(_clip_loss_kernel, inv_temp=1.0 / temp),
        grid=(1,),
        out_shape=jax.ShapeDtypeStruct((1, 1), jnp.float32),
        in_specs=[pl.BlockSpec((B, E), lambda i: (0, 0)),
                  pl.BlockSpec((B, E), lambda i: (0, 0))],
        out_specs=pl.BlockSpec((1, 1), lambda i: (0, 0)),
    )(query_feat, tar_feat)[0, 0]


# --------------------------------------------------------------------------
# Parameters (weights stored bf16 for MXU / HBM bandwidth; norms & biases f32)
# --------------------------------------------------------------------------

def init_params(key, *, C, P, D, depth, heads, mlp_hidden, embed_dim,
                num_patches):
    keys = iter(jax.random.split(key, 8 + 8 * depth))

    def w(shape, dtype=jnp.bfloat16):
        return (jax.random.normal(next(keys), shape, jnp.float32) * 0.02
                ).astype(dtype)

    params = dict(
        # conv2d(C, D, kernel=P, stride=P) realised as a (C*P*P, D) matmul
        patch_w=w((C * P * P, D)), patch_b=jnp.zeros((D,), jnp.float32),
        cls_token=w((1, 1, D), jnp.float32),
        pos_embed=w((1, num_patches + 1, D), jnp.float32),
        ln_g=jnp.ones((D,), jnp.float32), ln_b=jnp.zeros((D,), jnp.float32),
        vp_w=w((D, embed_dim)), vp_b=jnp.zeros((embed_dim,), jnp.float32),
        blocks=[],
    )
    for _ in range(depth):
        params["blocks"].append(dict(
            ln1_g=jnp.ones((D,), jnp.float32), ln1_b=jnp.zeros((D,), jnp.float32),
            qkv_w=w((D, 3 * D)), qkv_b=jnp.zeros((3 * D,), jnp.float32),
            proj_w=w((D, D)), proj_b=jnp.zeros((D,), jnp.float32),
            ln2_g=jnp.ones((D,), jnp.float32), ln2_b=jnp.zeros((D,), jnp.float32),
            fc1_w=w((D, mlp_hidden)), fc1_b=jnp.zeros((mlp_hidden,), jnp.float32),
            fc2_w=w((mlp_hidden, D)), fc2_b=jnp.zeros((D,), jnp.float32),
        ))
    return params


# --------------------------------------------------------------------------
# Forward
# --------------------------------------------------------------------------

def blip_cir_visual_forward(params, ref_img, tar_feat, *, patch_size,
                            num_heads, temp=0.07):
    B, C, H, W = ref_img.shape
    P = patch_size
    D = params["patch_w"].shape[1]
    nP = (H // P) * (W // P)
    S = nP + 1
    S_pad = ((S + 7) // 8) * 8

    # --- patch embed (conv-as-matmul): NCHW -> (B*nP, C*P*P) -> (B*nP, D)
    xp = ref_img.reshape(B, C, H // P, P, W // P, P)
    xp = xp.transpose(0, 2, 4, 1, 3, 5).reshape(B * nP, C * P * P)
    patches = matmul_fused(xp, params["patch_w"], params["patch_b"],
                           out_dtype=jnp.float32).reshape(B, nP, D)

    # --- cls token + positional embedding (glue, one-time cost)
    # TODO(synk): no pos-embed interpolation for non-default image sizes.
    cls = jnp.broadcast_to(params["cls_token"].astype(jnp.float32), (B, 1, D))
    x = jnp.concatenate([cls, patches], axis=1) + params["pos_embed"][:, :S, :]
    if S_pad > S:
        x = jnp.pad(x, ((0, 0), (0, S_pad - S), (0, 0)))
    x = x.reshape(B * S_pad, D)                      # f32 residual stream

    # --- transformer blocks: 4 fused pallas_calls per block
    for blk in params["blocks"]:
        qkv = ln_matmul(x, blk["ln1_g"], blk["ln1_b"],
                        blk["qkv_w"], blk["qkv_b"],
                        out_dtype=jnp.bfloat16)                      # (T, 3D)
        attn = attention(qkv.reshape(B, S_pad, 3 * D),
                         num_heads=num_heads, seq_valid=S)           # (B,S,D)
        x = matmul_fused(attn.reshape(B * S_pad, D),
                         blk["proj_w"], blk["proj_b"],
                         residual=x, out_dtype=jnp.float32)          # +residual
        x = mlp_block(x, blk["ln2_g"], blk["ln2_b"],
                      blk["fc1_w"], blk["fc1_b"],
                      blk["fc2_w"], blk["fc2_b"])                    # +residual

    # --- final LN on CLS rows only, fused with vision_proj + F.normalize
    cls_rows = x.reshape(B, S_pad, D)[:, 0, :]
    query_feat = ln_matmul(cls_rows, params["ln_g"], params["ln_b"],
                           params["vp_w"], params["vp_b"],
                           l2norm=True, out_dtype=jnp.float32)

    # --- symmetric InfoNCE at temperature temp (target normalize fused in)
    return clip_loss(query_feat, tar_feat, temp)


# --------------------------------------------------------------------------
# Main
# --------------------------------------------------------------------------

if __name__ == "__main__":
    B, C, H, W = 2, 3, 16, 16      # small image, NCHW
    PATCH = 8
    VISION_WIDTH = 128             # small stand-in for ViT-large width (1024)
    HEADS = 4
    DEPTH = 2
    MLP_HIDDEN = 256
    EMBED_DIM = 256                # module default embed_dim
    NUM_PATCHES = (H // PATCH) * (W // PATCH)

    key = jax.random.PRNGKey(0)
    k_param, k_img, k_tar = jax.random.split(key, 3)

    params = init_params(k_param, C=C, P=PATCH, D=VISION_WIDTH, depth=DEPTH,
                         heads=HEADS, mlp_hidden=MLP_HIDDEN,
                         embed_dim=EMBED_DIM, num_patches=NUM_PATCHES)

    ref_img = jax.random.normal(k_img, (B, C, H, W), jnp.float32)
    tar_feat = jax.random.normal(k_tar, (B, EMBED_DIM), jnp.float32)

    fwd = jax.jit(functools.partial(blip_cir_visual_forward,
                                    patch_size=PATCH, num_heads=HEADS,
                                    temp=0.07))
    loss = fwd(params, ref_img, tar_feat)
    jax.block_until_ready(loss)
    assert loss.shape == () and bool(jnp.isfinite(loss))
    print("KERNEL_OK")
</pallas_src>

<mosaic_0001>
module attributes {stable_mosaic.version = 11 : i64} {
  func.func @kernel(%arg0: i32, %arg1: i32, %arg2: i32, %arg3: memref<8x192xf32, #tpu.memory_space<vmem>>, %arg4: memref<192x128xbf16, #tpu.memory_space<vmem>>, %arg5: memref<1x128xf32, #tpu.memory_space<vmem>>, %arg6: memref<8x128xf32, #tpu.memory_space<vmem>>, %arg7: memref<8x128xf32, #tpu.memory_space<vmem>>) attributes {dimension_semantics = [#tpu.dimension_semantics<parallel>, #tpu.dimension_semantics<parallel>, #tpu.dimension_semantics<arbitrary>], iteration_bounds = array<i64: 1, 1, 1>, scalar_prefetch = 0 : i64, scratch_operands = 1 : i64, tpu.core_type = #tpu.core_type<tc>, window_params = [{transform_indices = @transform_0, window_bounds = array<i64: 8, 192>}, {transform_indices = @transform_1, window_bounds = array<i64: 192, 128>}, {transform_indices = @transform_2, window_bounds = array<i64: 1, 128>}, {transform_indices = @transform_3, window_bounds = array<i64: 8, 128>}]} {
    %c0_i32 = arith.constant 0 : i32
    %0 = arith.cmpi eq, %arg2, %c0_i32 : i32
    %1 = arith.extui %0 : i1 to i32
    %c0_i32_0 = arith.constant 0 : i32
    %2 = arith.cmpi ne, %1, %c0_i32_0 : i32
    scf.if %2 {
      %cst_10 = arith.constant 0.000000e+00 : f32
      %13 = vector.broadcast %cst_10 : f32 to vector<8x128xf32>
      %c0_11 = arith.constant 0 : index
      %c0_12 = arith.constant 0 : index
      %14 = vector.load %arg7[%c0_11, %c0_12] : memref<8x128xf32, #tpu.memory_space<vmem>>, vector<8x128xf32>
      tpu.vector_store %arg7[%c0_11, %c0_12], %13 {strides = array<i32>} : memref<8x128xf32, #tpu.memory_space<vmem>>, vector<8x128xf32>,
    } else {
    }
    %c0 = arith.constant 0 : index
    %c0_1 = arith.constant 0 : index
    %3 = vector.load %arg7[%c0, %c0_1] : memref<8x128xf32, #tpu.memory_space<vmem>>, vector<8x128xf32>
    %c0_2 = arith.constant 0 : index
    %c0_3 = arith.constant 0 : index
    %4 = vector.load %arg3[%c0_2, %c0_3] : memref<8x192xf32, #tpu.memory_space<vmem>>, vector<8x192xf32>
    %5 = arith.truncf %4 : vector<8x192xf32> to vector<8x192xbf16>
    %c0_4 = arith.constant 0 : index
    %c0_5 = arith.constant 0 : index
    %6 = vector.load %arg4[%c0_4, %c0_5] : memref<192x128xbf16, #tpu.memory_space<vmem>>, vector<192x128xbf16>
    %cst = arith.constant dense<0.000000e+00> : vector<8x128xf32>
    %7 = tpu.matmul %5, %6, %cst {dimension_numbers = #tpu.dot_dimension_numbers<[1], [0], [0], [1], [0, 0, 1, 1], [], []>} : vector<8x192xbf16>, vector<192x128xbf16>, vector<8x128xf32> -> vector<8x128xf32>
    %8 = arith.addf %3, %7 : vector<8x128xf32>
    %c0_6 = arith.constant 0 : index
    %c0_7 = arith.constant 0 : index
    %9 = vector.load %arg7[%c0_6, %c0_7] : memref<8x128xf32, #tpu.memory_space<vmem>>, vector<8x128xf32>
    tpu.vector_store %arg7[%c0_6, %c0_7], %8 {strides = array<i32>} : memref<8x128xf32, #tpu.memory_space<vmem>>, vector<8x128xf32>,
    %c0_i32_8 = arith.constant 0 : i32
    %10 = arith.cmpi eq, %arg2, %c0_i32_8 : i32
    %11 = arith.extui %10 : i1 to i32
    %c0_i32_9 = arith.constant 0 : i32
    %12 = arith.cmpi ne, %11, %c0_i32_9 : i32
    scf.if %12 {
      %c0_10 = arith.constant 0 : index
      %c0_11 = arith.constant 0 : index
      %13 = vector.load %arg7[%c0_10, %c0_11] : memref<8x128xf32, #tpu.memory_space<vmem>>, vector<8x128xf32>
      %c0_12 = arith.constant 0 : index
      %c0_13 = arith.constant 0 : index
      %14 = vector.load %arg5[%c0_12, %c0_13] : memref<1x128xf32, #tpu.memory_space<vmem>>, vector<1x128xf32>
      %15 = vector.broadcast %14 : vector<1x128xf32> to vector<8x128xf32>
      %16 = arith.addf %13, %15 : vector<8x128xf32>
      %c0_14 = arith.constant 0 : index
      %c0_15 = arith.constant 0 : index
      %17 = vector.load %arg6[%c0_14, %c0_15] : memref<8x128xf32, #tpu.memory_space<vmem>>, vector<8x128xf32>
      tpu.vector_store %arg6[%c0_14, %c0_15], %16 {strides = array<i32>} : memref<8x128xf32, #tpu.memory_space<vmem>>, vector<8x128xf32>,
    } else {
    }
    return
  }
  func.func @transform_0(%arg0: i32, %arg1: i32, %arg2: i32) -> (i32, i32) {
    %c0_i32 = arith.constant 0 : i32
    return %arg0, %arg2 : i32, i32
  }
  func.func @transform_1(%arg0: i32, %arg1: i32, %arg2: i32) -> (i32, i32) {
    %c0_i32 = arith.constant 0 : i32
    return %arg2, %arg1 : i32, i32
  }
  func.func @transform_2(%arg0: i32, %arg1: i32, %arg2: i32) -> (i32, i32) {
    %c0_i32 = arith.constant 0 : i32
    %c0_i32_0 = arith.constant 0 : i32
    return %c0_i32, %arg1 : i32, i32
  }
  func.func @transform_3(%arg0: i32, %arg1: i32, %arg2: i32) -> (i32, i32) {
    %c0_i32 = arith.constant 0 : i32
    return %arg0, %arg1 : i32, i32
  }
}

module attributes {stable_mosaic.version = 11 : i64} {
  func.func @kernel(%arg0: i32, %arg1: i32, %arg2: i32, %arg3: memref<16x128xbf16, #tpu.memory_space<vmem>>, %arg4: memref<128x128xbf16, #tpu.memory_space<vmem>>, %arg5: memref<1x128xf32, #tpu.memory_space<vmem>>, %arg6: memref<16x128xf32, #tpu.memory_space<vmem>>, %arg7: memref<16x128xf32, #tpu.memory_space<vmem>>, %arg8: memref<16x128xf32, #tpu.memory_space<vmem>>) attributes {dimension_semantics = [#tpu.dimension_semantics<parallel>, #tpu.dimension_semantics<parallel>, #tpu.dimension_semantics<arbitrary>], iteration_bounds = array<i64: 1, 1, 1>, scalar_prefetch = 0 : i64, scratch_operands = 1 : i64, tpu.core_type = #tpu.core_type<tc>, window_params = [{transform_indices = @transform_0, window_bounds = array<i64: 16, 128>}, {transform_indices = @transform_1, window_bounds = array<i64: 128, 128>}, {transform_indices = @transform_2, window_bounds = array<i64: 1, 128>}, {transform_indices = @transform_3, window_bounds = array<i64: 16, 128>}, {transform_indices = @transform_4, window_bounds = array<i64: 16, 128>}]} {
    %c0_i32 = arith.constant 0 : i32
    %0 = arith.cmpi eq, %arg2, %c0_i32 : i32
    %1 = arith.extui %0 : i1 to i32
    %c0_i32_0 = arith.constant 0 : i32
    %2 = arith.cmpi ne, %1, %c0_i32_0 : i32
    scf.if %2 {
      %cst_10 = arith.constant 0.000000e+00 : f32
      %12 = vector.broadcast %cst_10 : f32 to vector<16x128xf32>
      %c0_11 = arith.constant 0 : index
      %c0_12 = arith.constant 0 : index
      %13 = vector.load %arg8[%c0_11, %c0_12] : memref<16x128xf32, #tpu.memory_space<vmem>>, vector<16x128xf32>
      tpu.vector_store %arg8[%c0_11, %c0_12], %12 {strides = array<i32>} : memref<16x128xf32, #tpu.memory_space<vmem>>, vector<16x128xf32>,
    } else {
    }
    %c0 = arith.constant 0 : index
    %c0_1 = arith.constant 0 : index
    %3 = vector.load %arg8[%c0, %c0_1] : memref<16x128xf32, #tpu.memory_space<vmem>>, vector<16x128xf32>
    %c0_2 = arith.constant 0 : index
    %c0_3 = arith.constant 0 : index
    %4 = vector.load %arg3[%c0_2, %c0_3] : memref<16x128xbf16, #tpu.memory_space<vmem>>, vector<16x128xbf16>
    %c0_4 = arith.constant 0 : index
    %c0_5 = arith.constant 0 : index
    %5 = vector.load %arg4[%c0_4, %c0_5] : memref<128x128xbf16, #tpu.memory_space<vmem>>, vector<128x128xbf16>
    %cst = arith.constant dense<0.000000e+00> : vector<16x128xf32>
    %6 = tpu.matmul %4, %5, %cst {dimension_numbers = #tpu.dot_dimension_numbers<[1], [0], [0], [1], [0, 0, 1, 1], [], []>} : vector<16x128xbf16>, vector<128x128xbf16>, vector<16x128xf32> -> vector<16x128xf32>
    %7 = arith.addf %3, %6 : vector<16x128xf32>
    %c0_6 = arith.constant 0 : index
    %c0_7 = arith.constant 0 : index
    %8 = vector.load %arg8[%c0_6, %c0_7] : memref<16x128xf32, #tpu.memory_space<vmem>>, vector<16x128xf32>
    tpu.vector_store %arg8[%c0_6, %c0_7], %7 {strides = array<i32>} : memref<16x128xf32, #tpu.memory_space<vmem>>, vector<16x128xf32>,
    %c0_i32_8 = arith.constant 0 : i32
    %9 = arith.cmpi eq, %arg2, %c0_i32_8 : i32
    %10 = arith.extui %9 : i1 to i32
    %c0_i32_9 = arith.constant 0 : i32
    %11 = arith.cmpi ne, %10, %c0_i32_9 : i32
    scf.if %11 {
      %c0_10 = arith.constant 0 : index
      %c0_11 = arith.constant 0 : index
      %12 = vector.load %arg8[%c0_10, %c0_11] : memref<16x128xf32, #tpu.memory_space<vmem>>, vector<16x128xf32>
      %c0_12 = arith.constant 0 : index
      %c0_13 = arith.constant 0 : index
      %13 = vector.load %arg5[%c0_12, %c0_13] : memref<1x128xf32, #tpu.memory_space<vmem>>, vector<1x128xf32>
      %14 = vector.broadcast %13 : vector<1x128xf32> to vector<16x128xf32>
      %15 = arith.addf %12, %14 : vector<16x128xf32>
      %c0_14 = arith.constant 0 : index
      %c0_15 = arith.constant 0 : index
      %16 = vector.load %arg6[%c0_14, %c0_15] : memref<16x128xf32, #tpu.memory_space<vmem>>, vector<16x128xf32>
      %17 = arith.addf %15, %16 : vector<16x128xf32>
      %c0_16 = arith.constant 0 : index
      %c0_17 = arith.constant 0 : index
      %18 = vector.load %arg7[%c0_16, %c0_17] : memref<16x128xf32, #tpu.memory_space<vmem>>, vector<16x128xf32>
      tpu.vector_store %arg7[%c0_16, %c0_17], %17 {strides = array<i32>} : memref<16x128xf32, #tpu.memory_space<vmem>>, vector<16x128xf32>,
    } else {
    }
    return
  }
  func.func @transform_0(%arg0: i32, %arg1: i32, %arg2: i32) -> (i32, i32) {
    %c0_i32 = arith.constant 0 : i32
    return %arg0, %arg2 : i32, i32
  }
  func.func @transform_1(%arg0: i32, %arg1: i32, %arg2: i32) -> (i32, i32) {
    %c0_i32 = arith.constant 0 : i32
    return %arg2, %arg1 : i32, i32
  }
  func.func @transform_2(%arg0: i32, %arg1: i32, %arg2: i32) -> (i32, i32) {
    %c0_i32 = arith.constant 0 : i32
    %c0_i32_0 = arith.constant 0 : i32
    return %c0_i32, %arg1 : i32, i32
  }
  func.func @transform_3(%arg0: i32, %arg1: i32, %arg2: i32) -> (i32, i32) {
    %c0_i32 = arith.constant 0 : i32
    return %arg0, %arg1 : i32, i32
  }
  func.func @transform_4(%arg0: i32, %arg1: i32, %arg2: i32) -> (i32, i32) {
    %c0_i32 = arith.constant 0 : i32
    return %arg0, %arg1 : i32, i32
  }
}

module attributes {stable_mosaic.version = 11 : i64} {
  func.func @_ln_matmul_kernel(%arg0: i32, %arg1: i32, %arg2: memref<16x128xf32, #tpu.memory_space<vmem>>, %arg3: memref<1x128xf32, #tpu.memory_space<vmem>>, %arg4: memref<1x128xf32, #tpu.memory_space<vmem>>, %arg5: memref<128x384xbf16, #tpu.memory_space<vmem>>, %arg6: memref<1x384xf32, #tpu.memory_space<vmem>>, %arg7: memref<16x384xbf16, #tpu.memory_space<vmem>>) attributes {dimension_semantics = [#tpu.dimension_semantics<parallel>, #tpu.dimension_semantics<parallel>], iteration_bounds = array<i64: 1, 1>, scalar_prefetch = 0 : i64, scratch_operands = 0 : i64, tpu.core_type = #tpu.core_type<tc>, window_params = [{transform_indices = @transform_0, window_bounds = array<i64: 16, 128>}, {pipeline_mode = #tpu.pipeline_mode<synchronous>, transform_indices = @transform_1, window_bounds = array<i64: 1, 128>}, {pipeline_mode = #tpu.pipeline_mode<synchronous>, transform_indices = @transform_2, window_bounds = array<i64: 1, 128>}, {transform_indices = @transform_3, window_bounds = array<i64: 128, 384>}, {transform_indices = @transform_4, window_bounds = array<i64: 1, 384>}, {transform_indices = @transform_5, window_bounds = array<i64: 16, 384>}]} {
    %c0 = arith.constant 0 : index
    %c0_0 = arith.constant 0 : index
    %0 = vector.load %arg2[%c0, %c0_0] : memref<16x128xf32, #tpu.memory_space<vmem>>, vector<16x128xf32>
    %cst = arith.constant dense<0.000000e+00> : vector<16xf32>
    %1 = vector.multi_reduction <add>, %0, %cst [1] : vector<16x128xf32> to vector<16xf32>
    %2 = vector.shape_cast %1 : vector<16xf32> to vector<16x1xf32>
    %cst_1 = arith.constant 1.280000e+02 : f32
    %3 = vector.broadcast %cst_1 : f32 to vector<16x1xf32>
    %4 = arith.divf %2, %3 : vector<16x1xf32>
    %5 = vector.broadcast %4 : vector<16x1xf32> to vector<16x128xf32>
    %6 = arith.subf %0, %5 : vector<16x128xf32>
    %7 = arith.mulf %6, %6 : vector<16x128xf32>
    %cst_2 = arith.constant dense<0.000000e+00> : vector<16xf32>
    %8 = vector.multi_reduction <add>, %7, %cst_2 [1] : vector<16x128xf32> to vector<16xf32>
    %9 = vector.shape_cast %8 : vector<16xf32> to vector<16x1xf32>
    %cst_3 = arith.constant 1.280000e+02 : f32
    %10 = vector.broadcast %cst_3 : f32 to vector<16x1xf32>
    %11 = arith.divf %9, %10 : vector<16x1xf32>
    %cst_4 = arith.constant 9.99999997E-7 : f32
    %12 = vector.broadcast %cst_4 : f32 to vector<16x1xf32>
    %13 = arith.addf %11, %12 : vector<16x1xf32>
    %14 = math.rsqrt %13 : vector<16x1xf32>
    %15 = vector.broadcast %14 : vector<16x1xf32> to vector<16x128xf32>
    %16 = arith.mulf %6, %15 : vector<16x128xf32>
    %c0_5 = arith.constant 0 : index
    %c0_6 = arith.constant 0 : index
    %17 = vector.load %arg3[%c0_5, %c0_6] : memref<1x128xf32, #tpu.memory_space<vmem>>, vector<1x128xf32>
    %18 = vector.broadcast %17 : vector<1x128xf32> to vector<16x128xf32>
    %19 = arith.mulf %16, %18 : vector<16x128xf32>
    %c0_7 = arith.constant 0 : index
    %c0_8 = arith.constant 0 : index
    %20 = vector.load %arg4[%c0_7, %c0_8] : memref<1x128xf32, #tpu.memory_space<vmem>>, vector<1x128xf32>
    %21 = vector.broadcast %20 : vector<1x128xf32> to vector<16x128xf32>
    %22 = arith.addf %19, %21 : vector<16x128xf32>
    %23 = arith.truncf %22 : vector<16x128xf32> to vector<16x128xbf16>
    %c0_9 = arith.constant 0 : index
    %c0_10 = arith.constant 0 : index
    %24 = vector.load %arg5[%c0_9, %c0_10] : memref<128x384xbf16, #tpu.memory_space<vmem>>, vector<128x384xbf16>
    %cst_11 = arith.constant dense<0.000000e+00> : vector<16x384xf32>
    %25 = tpu.matmul %23, %24, %cst_11 {dimension_numbers = #tpu.dot_dimension_numbers<[1], [0], [0], [1], [0, 0, 1, 1], [], []>} : vector<16x128xbf16>, vector<128x384xbf16>, vector<16x384xf32> -> vector<16x384xf32>
    %c0_12 = arith.constant 0 : index
    %c0_13 = arith.constant 0 : index
    %26 = vector.load %arg6[%c0_12, %c0_13] : memref<1x384xf32, #tpu.memory_space<vmem>>, vector<1x384xf32>
    %27 = vector.broadcast %26 : vector<1x384xf32> to vector<16x384xf32>
    %28 = arith.addf %25, %27 : vector<16x384xf32>
    %29 = arith.truncf %28 : vector<16x384xf32> to vector<16x384xbf16>
    %c0_14 = arith.constant 0 : index
    %c0_15 = arith.constant 0 : index
    %30 = vector.load %arg7[%c0_14, %c0_15] : memref<16x384xbf16, #tpu.memory_space<vmem>>, vector<16x384xbf16>
    tpu.vector_store %arg7[%c0_14, %c0_15], %29 {strides = array<i32>} : memref<16x384xbf16, #tpu.memory_space<vmem>>, vector<16x384xbf16>,
    return
  }
  func.func @transform_0(%arg0: i32, %arg1: i32) -> (i32, i32) {
    %c0_i32 = arith.constant 0 : i32
    %c0_i32_0 = arith.constant 0 : i32
    return %arg0, %c0_i32 : i32, i32
  }
  func.func @transform_1(%arg0: i32, %arg1: i32) -> (i32, i32) {
    %c0_i32 = arith.constant 0 : i32
    %c0_i32_0 = arith.constant 0 : i32
    %c0_i32_1 = arith.constant 0 : i32
    return %c0_i32, %c0_i32_0 : i32, i32
  }
  func.func @transform_2(%arg0: i32, %arg1: i32) -> (i32, i32) {
    %c0_i32 = arith.constant 0 : i32
    %c0_i32_0 = arith.constant 0 : i32
    %c0_i32_1 = arith.constant 0 : i32
    return %c0_i32, %c0_i32_0 : i32, i32
  }
  func.func @transform_3(%arg0: i32, %arg1: i32) -> (i32, i32) {
    %c0_i32 = arith.constant 0 : i32
    %c0_i32_0 = arith.constant 0 : i32
    return %c0_i32, %arg1 : i32, i32
  }
  func.func @transform_4(%arg0: i32, %arg1: i32) -> (i32, i32) {
    %c0_i32 = arith.constant 0 : i32
    %c0_i32_0 = arith.constant 0 : i32
    return %c0_i32, %arg1 : i32, i32
  }
  func.func @transform_5(%arg0: i32, %arg1: i32) -> (i32, i32) {
    %c0_i32 = arith.constant 0 : i32
    return %arg0, %arg1 : i32, i32
  }
}

module attributes {stable_mosaic.version = 11 : i64} {
  func.func @_attn_kernel(%arg0: i32, %arg1: memref<1x8x384xbf16, #tpu.memory_space<vmem>>, %arg2: memref<1x8x128xbf16, #tpu.memory_space<vmem>>) attributes {dimension_semantics = [#tpu.dimension_semantics<parallel>], iteration_bounds = array<i64: 2>, scalar_prefetch = 0 : i64, scratch_operands = 0 : i64, tpu.core_type = #tpu.core_type<tc>, window_params = [{transform_indices = @transform_0, window_bounds = array<i64: 1, 8, 384>}, {transform_indices = @transform_1, window_bounds = array<i64: 1, 8, 128>}]} {
    %c0 = arith.constant 0 : index
    %c0_0 = arith.constant 0 : index
    %c0_1 = arith.constant 0 : index
    %0 = vector.load %arg1[%c0, %c0_0, %c0_1] : memref<1x8x384xbf16, #tpu.memory_space<vmem>>, vector<1x8x384xbf16>
    %1 = vector.shape_cast %0 : vector<1x8x384xbf16> to vector<8x384xbf16>
    %2 = tpu.iota {dimensions = array<i32: 1>} : vector<8x8xi32>
    %c5_i32 = arith.constant 5 : i32
    %3 = vector.broadcast %c5_i32 : i32 to vector<8x8xi32>
    %4 = arith.cmpi slt, %2, %3 : vector<8x8xi32>
    %5 = vector.extract_strided_slice %1 {offsets = [0, 0], sizes = [8, 32], strides = [1, 1]} : vector<8x384xbf16> to vector<8x32xbf16>
    %6 = vector.extract_strided_slice %1 {offsets = [0, 128], sizes = [8, 32], strides = [1, 1]} : vector<8x384xbf16> to vector<8x32xbf16>
    %7 = vector.extract_strided_slice %1 {offsets = [0, 256], sizes = [8, 32], strides = [1, 1]} : vector<8x384xbf16> to vector<8x32xbf16>
    %cst = arith.constant dense<0.000000e+00> : vector<8x8xf32>
    %8 = tpu.matmul %5, %6, %cst {dimension_numbers = #tpu.dot_dimension_numbers<[1], [1], [0], [0], [0, 0, 1, 0], [], []>} : vector<8x32xbf16>, vector<8x32xbf16>, vector<8x8xf32> -> vector<8x8xf32>
    %cst_2 = arith.constant 0.176776692 : f32
    %9 = vector.broadcast %cst_2 : f32 to vector<8x8xf32>
    %10 = arith.mulf %8, %9 : vector<8x8xf32>
    %cst_3 = arith.constant -1.000000e+30 : f32
    %11 = vector.broadcast %cst_3 : f32 to vector<8x8xf32>
    %12 = arith.select %4, %10, %11 : vector<8x8xi1>, vector<8x8xf32>
    %cst_4 = arith.constant dense<0xFF800000> : vector<8xf32>
    %13 = vector.multi_reduction <maximumf>, %12, %cst_4 [1] : vector<8x8xf32> to vector<8xf32>
    %14 = vector.shape_cast %13 : vector<8xf32> to vector<8x1xf32>
    %15 = vector.broadcast %14 : vector<8x1xf32> to vector<8x8xf32>
    %16 = arith.subf %12, %15 : vector<8x8xf32>
    %17 = math.exp %16 : vector<8x8xf32>
    %cst_5 = arith.constant dense<0.000000e+00> : vector<8xf32>
    %18 = vector.multi_reduction <add>, %17, %cst_5 [1] : vector<8x8xf32> to vector<8xf32>
    %19 = vector.shape_cast %18 : vector<8xf32> to vector<8x1xf32>
    %20 = tpu.reciprocal %19 {approx = true} : vector<8x1xf32> -> vector<8x1xf32>
    %21 = vector.broadcast %20 : vector<8x1xf32> to vector<8x8xf32>
    %22 = arith.mulf %17, %21 : vector<8x8xf32>
    %23 = arith.truncf %22 : vector<8x8xf32> to vector<8x8xbf16>
    %cst_6 = arith.constant dense<0.000000e+00> : vector<8x32xf32>
    %24 = tpu.matmul %23, %7, %cst_6 {dimension_numbers = #tpu.dot_dimension_numbers<[1], [0], [0], [1], [0, 0, 1, 1], [], []>} : vector<8x8xbf16>, vector<8x32xbf16>, vector<8x32xf32> -> vector<8x32xf32>
    %25 = vector.extract_strided_slice %1 {offsets = [0, 32], sizes = [8, 32], strides = [1, 1]} : vector<8x384xbf16> to vector<8x32xbf16>
    %26 = vector.extract_strided_slice %1 {offsets = [0, 160], sizes = [8, 32], strides = [1, 1]} : vector<8x384xbf16> to vector<8x32xbf16>
    %27 = vector.extract_strided_slice %1 {offsets = [0, 288], sizes = [8, 32], strides = [1, 1]} : vector<8x384xbf16> to vector<8x32xbf16>
    %cst_7 = arith.constant dense<0.000000e+00> : vector<8x8xf32>
    %28 = tpu.matmul %25, %26, %cst_7 {dimension_numbers = #tpu.dot_dimension_numbers<[1], [1], [0], [0], [0, 0, 1, 0], [], []>} : vector<8x32xbf16>, vector<8x32xbf16>, vector<8x8xf32> -> vector<8x8xf32>
    %cst_8 = arith.constant 0.176776692 : f32
    %29 = vector.broadcast %cst_8 : f32 to vector<8x8xf32>
    %30 = arith.mulf %28, %29 : vector<8x8xf32>
    %cst_9 = arith.constant -1.000000e+30 : f32
    %31 = vector.broadcast %cst_9 : f32 to vector<8x8xf32>
    %32 = arith.select %4, %30, %31 : vector<8x8xi1>, vector<8x8xf32>
    %cst_10 = arith.constant dense<0xFF800000> : vector<8xf32>
    %33 = vector.multi_reduction <maximumf>, %32, %cst_10 [1] : vector<8x8xf32> to vector<8xf32>
    %34 = vector.shape_cast %33 : vector<8xf32> to vector<8x1xf32>
    %35 = vector.broadcast %34 : vector<8x1xf32> to vector<8x8xf32>
    %36 = arith.subf %32, %35 : vector<8x8xf32>
    %37 = math.exp %36 : vector<8x8xf32>
    %cst_11 = arith.constant dense<0.000000e+00> : vector<8xf32>
    %38 = vector.multi_reduction <add>, %37, %cst_11 [1] : vector<8x8xf32> to vector<8xf32>
    %39 = vector.shape_cast %38 : vector<8xf32> to vector<8x1xf32>
    %40 = tpu.reciprocal %39 {approx = true} : vector<8x1xf32> -> vector<8x1xf32>
    %41 = vector.broadcast %40 : vector<8x1xf32> to vector<8x8xf32>
    %42 = arith.mulf %37, %41 : vector<8x8xf32>
    %43 = arith.truncf %42 : vector<8x8xf32> to vector<8x8xbf16>
    %cst_12 = arith.constant dense<0.000000e+00> : vector<8x32xf32>
    %44 = tpu.matmul %43, %27, %cst_12 {dimension_numbers = #tpu.dot_dimension_numbers<[1], [0], [0], [1], [0, 0, 1, 1], [], []>} : vector<8x8xbf16>, vector<8x32xbf16>, vector<8x32xf32> -> vector<8x32xf32>
    %45 = vector.extract_strided_slice %1 {offsets = [0, 64], sizes = [8, 32], strides = [1, 1]} : vector<8x384xbf16> to vector<8x32xbf16>
    %46 = vector.extract_strided_slice %1 {offsets = [0, 192], sizes = [8, 32], strides = [1, 1]} : vector<8x384xbf16> to vector<8x32xbf16>
    %47 = vector.extract_strided_slice %1 {offsets = [0, 320], sizes = [8, 32], strides = [1, 1]} : vector<8x384xbf16> to vector<8x32xbf16>
    %cst_13 = arith.constant dense<0.000000e+00> : vector<8x8xf32>
    %48 = tpu.matmul %45, %46, %cst_13 {dimension_numbers = #tpu.dot_dimension_numbers<[1], [1], [0], [0], [0, 0, 1, 0], [], []>} : vector<8x32xbf16>, vector<8x32xbf16>, vector<8x8xf32> -> vector<8x8xf32>
    %cst_14 = arith.constant 0.176776692 : f32
    %49 = vector.broadcast %cst_14 : f32 to vector<8x8xf32>
    %50 = arith.mulf %48, %49 : vector<8x8xf32>
    %cst_15 = arith.constant -1.000000e+30 : f32
    %51 = vector.broadcast %cst_15 : f32 to vector<8x8xf32>
    %52 = arith.select %4, %50, %51 : vector<8x8xi1>, vector<8x8xf32>
    %cst_16 = arith.constant dense<0xFF800000> : vector<8xf32>
    %53 = vector.multi_reduction <maximumf>, %52, %cst_16 [1] : vector<8x8xf32> to vector<8xf32>
    %54 = vector.shape_cast %53 : vector<8xf32> to vector<8x1xf32>
    %55 = vector.broadcast %54 : vector<8x1xf32> to vector<8x8xf32>
    %56 = arith.subf %52, %55 : vector<8x8xf32>
    %57 = math.exp %56 : vector<8x8xf32>
    %cst_17 = arith.constant dense<0.000000e+00> : vector<8xf32>
    %58 = vector.multi_reduction <add>, %57, %cst_17 [1] : vector<8x8xf32> to vector<8xf32>
    %59 = vector.shape_cast %58 : vector<8xf32> to vector<8x1xf32>
    %60 = tpu.reciprocal %59 {approx = true} : vector<8x1xf32> -> vector<8x1xf32>
    %61 = vector.broadcast %60 : vector<8x1xf32> to vector<8x8xf32>
    %62 = arith.mulf %57, %61 : vector<8x8xf32>
    %63 = arith.truncf %62 : vector<8x8xf32> to vector<8x8xbf16>
    %cst_18 = arith.constant dense<0.000000e+00> : vector<8x32xf32>
    %64 = tpu.matmul %63, %47, %cst_18 {dimension_numbers = #tpu.dot_dimension_numbers<[1], [0], [0], [1], [0, 0, 1, 1], [], []>} : vector<8x8xbf16>, vector<8x32xbf16>, vector<8x32xf32> -> vector<8x32xf32>
    %65 = vector.extract_strided_slice %1 {offsets = [0, 96], sizes = [8, 32], strides = [1, 1]} : vector<8x384xbf16> to vector<8x32xbf16>
    %66 = vector.extract_strided_slice %1 {offsets = [0, 224], sizes = [8, 32], strides = [1, 1]} : vector<8x384xbf16> to vector<8x32xbf16>
    %67 = vector.extract_strided_slice %1 {offsets = [0, 352], sizes = [8, 32], strides = [1, 1]} : vector<8x384xbf16> to vector<8x32xbf16>
    %cst_19 = arith.constant dense<0.000000e+00> : vector<8x8xf32>
    %68 = tpu.matmul %65, %66, %cst_19 {dimension_numbers = #tpu.dot_dimension_numbers<[1], [1], [0], [0], [0, 0, 1, 0], [], []>} : vector<8x32xbf16>, vector<8x32xbf16>, vector<8x8xf32> -> vector<8x8xf32>
    %cst_20 = arith.constant 0.176776692 : f32
    %69 = vector.broadcast %cst_20 : f32 to vector<8x8xf32>
    %70 = arith.mulf %68, %69 : vector<8x8xf32>
    %cst_21 = arith.constant -1.000000e+30 : f32
    %71 = vector.broadcast %cst_21 : f32 to vector<8x8xf32>
    %72 = arith.select %4, %70, %71 : vector<8x8xi1>, vector<8x8xf32>
    %cst_22 = arith.constant dense<0xFF800000> : vector<8xf32>
    %73 = vector.multi_reduction <maximumf>, %72, %cst_22 [1] : vector<8x8xf32> to vector<8xf32>
    %74 = vector.shape_cast %73 : vector<8xf32> to vector<8x1xf32>
    %75 = vector.broadcast %74 : vector<8x1xf32> to vector<8x8xf32>
    %76 = arith.subf %72, %75 : vector<8x8xf32>
    %77 = math.exp %76 : vector<8x8xf32>
    %cst_23 = arith.constant dense<0.000000e+00> : vector<8xf32>
    %78 = vector.multi_reduction <add>, %77, %cst_23 [1] : vector<8x8xf32> to vector<8xf32>
    %79 = vector.shape_cast %78 : vector<8xf32> to vector<8x1xf32>
    %80 = tpu.reciprocal %79 {approx = true} : vector<8x1xf32> -> vector<8x1xf32>
    %81 = vector.broadcast %80 : vector<8x1xf32> to vector<8x8xf32>
    %82 = arith.mulf %77, %81 : vector<8x8xf32>
    %83 = arith.truncf %82 : vector<8x8xf32> to vector<8x8xbf16>
    %cst_24 = arith.constant dense<0.000000e+00> : vector<8x32xf32>
    %84 = tpu.matmul %83, %67, %cst_24 {dimension_numbers = #tpu.dot_dimension_numbers<[1], [0], [0], [1], [0, 0, 1, 1], [], []>} : vector<8x8xbf16>, vector<8x32xbf16>, vector<8x32xf32> -> vector<8x32xf32>
    %85 = tpu.concatenate %24, %44, %64, %84 in 1 : vector<8x32xf32>, vector<8x32xf32>, vector<8x32xf32>, vector<8x32xf32> -> vector<8x128xf32>
    %86 = arith.truncf %85 : vector<8x128xf32> to vector<8x128xbf16>
    %c0_25 = arith.constant 0 : index
    %c0_26 = arith.constant 0 : index
    %c0_27 = arith.constant 0 : index
    %87 = vector.load %arg2[%c0_25, %c0_26, %c0_27] : memref<1x8x128xbf16, #tpu.memory_space<vmem>>, vector<1x8x128xbf16>
    %88 = vector.shape_cast %87 : vector<1x8x128xbf16> to vector<8x128xbf16>
    %89 = vector.shape_cast %86 : vector<8x128xbf16> to vector<1x8x128xbf16>
    tpu.vector_store %arg2[%c0_25, %c0_26, %c0_27], %89 {strides = array<i32>} : memref<1x8x128xbf16, #tpu.memory_space<vmem>>, vector<1x8x128xbf16>,
    return
  }
  func.func @transform_0(%arg0: i32) -> (i32, i32, i32) {
    %c0_i32 = arith.constant 0 : i32
    %c0_i32_0 = arith.constant 0 : i32
    %c0_i32_1 = arith.constant 0 : i32
    return %arg0, %c0_i32, %c0_i32_0 : i32, i32, i32
  }
  func.func @transform_1(%arg0: i32) -> (i32, i32, i32) {
    %c0_i32 = arith.constant 0 : i32
    %c0_i32_0 = arith.constant 0 : i32
    %c0_i32_1 = arith.constant 0 : i32
    return %arg0, %c0_i32, %c0_i32_0 : i32, i32, i32
  }
}

module attributes {stable_mosaic.version = 11 : i64} {
  func.func @_mlp_kernel(%arg0: i32, %arg1: i32, %arg2: memref<16x128xf32, #tpu.memory_space<vmem>>, %arg3: memref<1x128xf32, #tpu.memory_space<vmem>>, %arg4: memref<1x128xf32, #tpu.memory_space<vmem>>, %arg5: memref<128x256xbf16, #tpu.memory_space<vmem>>, %arg6: memref<1x256xf32, #tpu.memory_space<vmem>>, %arg7: memref<256x128xbf16, #tpu.memory_space<vmem>>, %arg8: memref<1x128xf32, #tpu.memory_space<vmem>>, %arg9: memref<16x128xf32, #tpu.memory_space<vmem>>, %arg10: memref<16x128xf32, #tpu.memory_space<vmem>>, %arg11: memref<16x128xbf16, #tpu.memory_space<vmem>>) attributes {dimension_semantics = [#tpu.dimension_semantics<parallel>, #tpu.dimension_semantics<arbitrary>], iteration_bounds = array<i64: 1, 1>, scalar_prefetch = 0 : i64, scratch_operands = 2 : i64, tpu.core_type = #tpu.core_type<tc>, window_params = [{transform_indices = @transform_0, window_bounds = array<i64: 16, 128>}, {pipeline_mode = #tpu.pipeline_mode<synchronous>, transform_indices = @transform_1, window_bounds = array<i64: 1, 128>}, {pipeline_mode = #tpu.pipeline_mode<synchronous>, transform_indices = @transform_2, window_bounds = array<i64: 1, 128>}, {transform_indices = @transform_3, window_bounds = array<i64: 128, 256>}, {transform_indices = @transform_4, window_bounds = array<i64: 1, 256>}, {transform_indices = @transform_5, window_bounds = array<i64: 256, 128>}, {pipeline_mode = #tpu.pipeline_mode<synchronous>, transform_indices = @transform_6, window_bounds = array<i64: 1, 128>}, {transform_indices = @transform_7, window_bounds = array<i64: 16, 128>}]} {
    %c0_i32 = arith.constant 0 : i32
    %0 = arith.cmpi eq, %arg1, %c0_i32 : i32
    %1 = arith.extui %0 : i1 to i32
    %c0_i32_0 = arith.constant 0 : i32
    %2 = arith.cmpi ne, %1, %c0_i32_0 : i32
    scf.if %2 {
      %c0_19 = arith.constant 0 : index
      %c0_20 = arith.constant 0 : index
      %31 = vector.load %arg2[%c0_19, %c0_20] : memref<16x128xf32, #tpu.memory_space<vmem>>, vector<16x128xf32>
      %cst_21 = arith.constant dense<0.000000e+00> : vector<16xf32>
      %32 = vector.multi_reduction <add>, %31, %cst_21 [1] : vector<16x128xf32> to vector<16xf32>
      %33 = vector.shape_cast %32 : vector<16xf32> to vector<16x1xf32>
      %cst_22 = arith.constant 1.280000e+02 : f32
      %34 = vector.broadcast %cst_22 : f32 to vector<16x1xf32>
      %35 = arith.divf %33, %34 : vector<16x1xf32>
      %36 = vector.broadcast %35 : vector<16x1xf32> to vector<16x128xf32>
      %37 = arith.subf %31, %36 : vector<16x128xf32>
      %38 = arith.mulf %37, %37 : vector<16x128xf32>
      %cst_23 = arith.constant dense<0.000000e+00> : vector<16xf32>
      %39 = vector.multi_reduction <add>, %38, %cst_23 [1] : vector<16x128xf32> to vector<16xf32>
      %40 = vector.shape_cast %39 : vector<16xf32> to vector<16x1xf32>
      %cst_24 = arith.constant 1.280000e+02 : f32
      %41 = vector.broadcast %cst_24 : f32 to vector<16x1xf32>
      %42 = arith.divf %40, %41 : vector<16x1xf32>
      %cst_25 = arith.constant 9.99999997E-7 : f32
      %43 = vector.broadcast %cst_25 : f32 to vector<16x1xf32>
      %44 = arith.addf %42, %43 : vector<16x1xf32>
      %45 = math.rsqrt %44 : vector<16x1xf32>
      %46 = vector.broadcast %45 : vector<16x1xf32> to vector<16x128xf32>
      %47 = arith.mulf %37, %46 : vector<16x128xf32>
      %c0_26 = arith.constant 0 : index
      %c0_27 = arith.constant 0 : index
      %48 = vector.load %arg3[%c0_26, %c0_27] : memref<1x128xf32, #tpu.memory_space<vmem>>, vector<1x128xf32>
      %49 = vector.broadcast %48 : vector<1x128xf32> to vector<16x128xf32>
      %50 = arith.mulf %47, %49 : vector<16x128xf32>
      %c0_28 = arith.constant 0 : index
      %c0_29 = arith.constant 0 : index
      %51 = vector.load %arg4[%c0_28, %c0_29] : memref<1x128xf32, #tpu.memory_space<vmem>>, vector<1x128xf32>
      %52 = vector.broadcast %51 : vector<1x128xf32> to vector<16x128xf32>
      %53 = arith.addf %50, %52 : vector<16x128xf32>
      %54 = arith.truncf %53 : vector<16x128xf32> to vector<16x128xbf16>
      %c0_30 = arith.constant 0 : index
      %c0_31 = arith.constant 0 : index
      %55 = vector.load %arg11[%c0_30, %c0_31] : memref<16x128xbf16, #tpu.memory_space<vmem>>, vector<16x128xbf16>
      tpu.vector_store %arg11[%c0_30, %c0_31], %54 {strides = array<i32>} : memref<16x128xbf16, #tpu.memory_space<vmem>>, vector<16x128xbf16>,
      %cst_32 = arith.constant 0.000000e+00 : f32
      %56 = vector.broadcast %cst_32 : f32 to vector<16x128xf32>
      %c0_33 = arith.constant 0 : index
      %c0_34 = arith.constant 0 : index
      %57 = vector.load %arg10[%c0_33, %c0_34] : memref<16x128xf32, #tpu.memory_space<vmem>>, vector<16x128xf32>
      tpu.vector_store %arg10[%c0_33, %c0_34], %56 {strides = array<i32>} : memref<16x128xf32, #tpu.memory_space<vmem>>, vector<16x128xf32>,
    } else {
    }
    %c0 = arith.constant 0 : index
    %c0_1 = arith.constant 0 : index
    %3 = vector.load %arg11[%c0, %c0_1] : memref<16x128xbf16, #tpu.memory_space<vmem>>, vector<16x128xbf16>
    %c0_2 = arith.constant 0 : index
    %c0_3 = arith.constant 0 : index
    %4 = vector.load %arg5[%c0_2, %c0_3] : memref<128x256xbf16, #tpu.memory_space<vmem>>, vector<128x256xbf16>
    %cst = arith.constant dense<0.000000e+00> : vector<16x256xf32>
    %5 = tpu.matmul %3, %4, %cst {dimension_numbers = #tpu.dot_dimension_numbers<[1], [0], [0], [1], [0, 0, 1, 1], [], []>} : vector<16x128xbf16>, vector<128x256xbf16>, vector<16x256xf32> -> vector<16x256xf32>
    %c0_4 = arith.constant 0 : index
    %c0_5 = arith.constant 0 : index
    %6 = vector.load %arg6[%c0_4, %c0_5] : memref<1x256xf32, #tpu.memory_space<vmem>>, vector<1x256xf32>
    %7 = vector.broadcast %6 : vector<1x256xf32> to vector<16x256xf32>
    %8 = arith.addf %5, %7 : vector<16x256xf32>
    %9 = arith.mulf %8, %8 : vector<16x256xf32>
    %10 = arith.mulf %8, %9 : vector<16x256xf32>
    %cst_6 = arith.constant 4.471500e-02 : f32
    %11 = vector.broadcast %cst_6 : f32 to vector<16x256xf32>
    %12 = arith.mulf %11, %10 : vector<16x256xf32>
    %13 = arith.addf %8, %12 : vector<16x256xf32>
    %cst_7 = arith.constant 0.797884583 : f32
    %14 = vector.broadcast %cst_7 : f32 to vector<16x256xf32>
    %15 = arith.mulf %14, %13 : vector<16x256xf32>
    %16 = math.tanh %15 : vector<16x256xf32>
    %cst_8 = arith.constant 1.000000e+00 : f32
    %17 = vector.broadcast %cst_8 : f32 to vector<16x256xf32>
    %18 = arith.addf %17, %16 : vector<16x256xf32>
    %cst_9 = arith.constant 5.000000e-01 : f32
    %19 = vector.broadcast %cst_9 : f32 to vector<16x256xf32>
    %20 = arith.mulf %19, %18 : vector<16x256xf32>
    %21 = arith.mulf %8, %20 : vector<16x256xf32>
    %c0_10 = arith.constant 0 : index
    %c0_11 = arith.constant 0 : index
    %22 = vector.load %arg10[%c0_10, %c0_11] : memref<16x128xf32, #tpu.memory_space<vmem>>, vector<16x128xf32>
    %23 = arith.truncf %21 : vector<16x256xf32> to vector<16x256xbf16>
    %c0_12 = arith.constant 0 : index
    %c0_13 = arith.constant 0 : index
    %24 = vector.load %arg7[%c0_12, %c0_13] : memref<256x128xbf16, #tpu.memory_space<vmem>>, vector<256x128xbf16>
    %cst_14 = arith.constant dense<0.000000e+00> : vector<16x128xf32>
    %25 = tpu.matmul %23, %24, %cst_14 {dimension_numbers = #tpu.dot_dimension_numbers<[1], [0], [0], [1], [0, 0, 1, 1], [], []>} : vector<16x256xbf16>, vector<256x128xbf16>, vector<16x128xf32> -> vector<16x128xf32>
    %26 = arith.addf %22, %25 : vector<16x128xf32>
    %c0_15 = arith.constant 0 : index
    %c0_16 = arith.constant 0 : index
    %27 = vector.load %arg10[%c0_15, %c0_16] : memref<16x128xf32, #tpu.memory_space<vmem>>, vector<16x128xf32>
    tpu.vector_store %arg10[%c0_15, %c0_16], %26 {strides = array<i32>} : memref<16x128xf32, #tpu.memory_space<vmem>>, vector<16x128xf32>,
    %c0_i32_17 = arith.constant 0 : i32
    %28 = arith.cmpi eq, %arg1, %c0_i32_17 : i32
    %29 = arith.extui %28 : i1 to i32
    %c0_i32_18 = arith.constant 0 : i32
    %30 = arith.cmpi ne, %29, %c0_i32_18 : i32
    scf.if %30 {
      %c0_19 = arith.constant 0 : index
      %c0_20 = arith.constant 0 : index
      %31 = vector.load %arg2[%c0_19, %c0_20] : memref<16x128xf32, #tpu.memory_space<vmem>>, vector<16x128xf32>
      %c0_21 = arith.constant 0 : index
      %c0_22 = arith.constant 0 : index
      %32 = vector.load %arg10[%c0_21, %c0_22] : memref<16x128xf32, #tpu.memory_space<vmem>>, vector<16x128xf32>
      %33 = arith.addf %31, %32 : vector<16x128xf32>
      %c0_23 = arith.constant 0 : index
      %c0_24 = arith.constant 0 : index
      %34 = vector.load %arg8[%c0_23, %c0_24] : memref<1x128xf32, #tpu.memory_space<vmem>>, vector<1x128xf32>
      %35 = vector.broadcast %34 : vector<1x128xf32> to vector<16x128xf32>
      %36 = arith.addf %33, %35 : vector<16x128xf32>
      %c0_25 = arith.constant 0 : index
      %c0_26 = arith.constant 0 : index
      %37 = vector.load %arg9[%c0_25, %c0_26] : memref<16x128xf32, #tpu.memory_space<vmem>>, vector<16x128xf32>
      tpu.vector_store %arg9[%c0_25, %c0_26], %36 {strides = array<i32>} : memref<16x128xf32, #tpu.memory_space<vmem>>, vector<16x128xf32>,
    } else {
    }
    return
  }
  func.func @transform_0(%arg0: i32, %arg1: i32) -> (i32, i32) {
    %c0_i32 = arith.constant 0 : i32
    %c0_i32_0 = arith.constant 0 : i32
    return %arg0, %c0_i32 : i32, i32
  }
  func.func @transform_1(%arg0: i32, %arg1: i32) -> (i32, i32) {
    %c0_i32 = arith.constant 0 : i32
    %c0_i32_0 = arith.constant 0 : i32
    %c0_i32_1 = arith.constant 0 : i32
    return %c0_i32, %c0_i32_0 : i32, i32
  }
  func.func @transform_2(%arg0: i32, %arg1: i32) -> (i32, i32) {
    %c0_i32 = arith.constant 0 : i32
    %c0_i32_0 = arith.constant 0 : i32
    %c0_i32_1 = arith.constant 0 : i32
    return %c0_i32, %c0_i32_0 : i32, i32
  }
  func.func @transform_3(%arg0: i32, %arg1: i32) -> (i32, i32) {
    %c0_i32 = arith.constant 0 : i32
    %c0_i32_0 = arith.constant 0 : i32
    return %c0_i32, %arg1 : i32, i32
  }
  func.func @transform_4(%arg0: i32, %arg1: i32) -> (i32, i32) {
    %c0_i32 = arith.constant 0 : i32
    %c0_i32_0 = arith.constant 0 : i32
    return %c0_i32, %arg1 : i32, i32
  }
  func.func @transform_5(%arg0: i32, %arg1: i32) -> (i32, i32) {
    %c0_i32 = arith.constant 0 : i32
    %c0_i32_0 = arith.constant 0 : i32
    return %arg1, %c0_i32 : i32, i32
  }
  func.func @transform_6(%arg0: i32, %arg1: i32) -> (i32, i32) {
    %c0_i32 = arith.constant 0 : i32
    %c0_i32_0 = arith.constant 0 : i32
    %c0_i32_1 = arith.constant 0 : i32
    return %c0_i32, %c0_i32_0 : i32, i32
  }
  func.func @transform_7(%arg0: i32, %arg1: i32) -> (i32, i32) {
    %c0_i32 = arith.constant 0 : i32
    %c0_i32_0 = arith.constant 0 : i32
    return %arg0, %c0_i32 : i32, i32
  }
}

module attributes {stable_mosaic.version = 11 : i64} {
  func.func @_ln_matmul_kernel(%arg0: i32, %arg1: i32, %arg2: memref<2x128xf32, #tpu.memory_space<vmem>>, %arg3: memref<1x128xf32, #tpu.memory_space<vmem>>, %arg4: memref<1x128xf32, #tpu.memory_space<vmem>>, %arg5: memref<128x256xbf16, #tpu.memory_space<vmem>>, %arg6: memref<1x256xf32, #tpu.memory_space<vmem>>, %arg7: memref<2x256xf32, #tpu.memory_space<vmem>>) attributes {dimension_semantics = [#tpu.dimension_semantics<parallel>, #tpu.dimension_semantics<parallel>], iteration_bounds = array<i64: 1, 1>, scalar_prefetch = 0 : i64, scratch_operands = 0 : i64, tpu.core_type = #tpu.core_type<tc>, window_params = [{transform_indices = @transform_0, window_bounds = array<i64: 2, 128>}, {pipeline_mode = #tpu.pipeline_mode<synchronous>, transform_indices = @transform_1, window_bounds = array<i64: 1, 128>}, {pipeline_mode = #tpu.pipeline_mode<synchronous>, transform_indices = @transform_2, window_bounds = array<i64: 1, 128>}, {transform_indices = @transform_3, window_bounds = array<i64: 128, 256>}, {transform_indices = @transform_4, window_bounds = array<i64: 1, 256>}, {transform_indices = @transform_5, window_bounds = array<i64: 2, 256>}]} {
    %c0 = arith.constant 0 : index
    %c0_0 = arith.constant 0 : index
    %0 = vector.load %arg2[%c0, %c0_0] : memref<2x128xf32, #tpu.memory_space<vmem>>, vector<2x128xf32>
    %cst = arith.constant dense<0.000000e+00> : vector<2xf32>
    %1 = vector.multi_reduction <add>, %0, %cst [1] : vector<2x128xf32> to vector<2xf32>
    %2 = vector.shape_cast %1 : vector<2xf32> to vector<2x1xf32>
    %cst_1 = arith.constant 1.280000e+02 : f32
    %3 = vector.broadcast %cst_1 : f32 to vector<2x1xf32>
    %4 = arith.divf %2, %3 : vector<2x1xf32>
    %5 = vector.broadcast %4 : vector<2x1xf32> to vector<2x128xf32>
    %6 = arith.subf %0, %5 : vector<2x128xf32>
    %7 = arith.mulf %6, %6 : vector<2x128xf32>
    %cst_2 = arith.constant dense<0.000000e+00> : vector<2xf32>
    %8 = vector.multi_reduction <add>, %7, %cst_2 [1] : vector<2x128xf32> to vector<2xf32>
    %9 = vector.shape_cast %8 : vector<2xf32> to vector<2x1xf32>
    %cst_3 = arith.constant 1.280000e+02 : f32
    %10 = vector.broadcast %cst_3 : f32 to vector<2x1xf32>
    %11 = arith.divf %9, %10 : vector<2x1xf32>
    %cst_4 = arith.constant 9.99999997E-7 : f32
    %12 = vector.broadcast %cst_4 : f32 to vector<2x1xf32>
    %13 = arith.addf %11, %12 : vector<2x1xf32>
    %14 = math.rsqrt %13 : vector<2x1xf32>
    %15 = vector.broadcast %14 : vector<2x1xf32> to vector<2x128xf32>
    %16 = arith.mulf %6, %15 : vector<2x128xf32>
    %c0_5 = arith.constant 0 : index
    %c0_6 = arith.constant 0 : index
    %17 = vector.load %arg3[%c0_5, %c0_6] : memref<1x128xf32, #tpu.memory_space<vmem>>, vector<1x128xf32>
    %18 = vector.broadcast %17 : vector<1x128xf32> to vector<2x128xf32>
    %19 = arith.mulf %16, %18 : vector<2x128xf32>
    %c0_7 = arith.constant 0 : index
    %c0_8 = arith.constant 0 : index
    %20 = vector.load %arg4[%c0_7, %c0_8] : memref<1x128xf32, #tpu.memory_space<vmem>>, vector<1x128xf32>
    %21 = vector.broadcast %20 : vector<1x128xf32> to vector<2x128xf32>
    %22 = arith.addf %19, %21 : vector<2x128xf32>
    %23 = arith.truncf %22 : vector<2x128xf32> to vector<2x128xbf16>
    %c0_9 = arith.constant 0 : index
    %c0_10 = arith.constant 0 : index
    %24 = vector.load %arg5[%c0_9, %c0_10] : memref<128x256xbf16, #tpu.memory_space<vmem>>, vector<128x256xbf16>
    %cst_11 = arith.constant dense<0.000000e+00> : vector<2x256xf32>
    %25 = tpu.matmul %23, %24, %cst_11 {dimension_numbers = #tpu.dot_dimension_numbers<[1], [0], [0], [1], [0, 0, 1, 1], [], []>} : vector<2x128xbf16>, vector<128x256xbf16>, vector<2x256xf32> -> vector<2x256xf32>
    %c0_12 = arith.constant 0 : index
    %c0_13 = arith.constant 0 : index
    %26 = vector.load %arg6[%c0_12, %c0_13] : memref<1x256xf32, #tpu.memory_space<vmem>>, vector<1x256xf32>
    %27 = vector.broadcast %26 : vector<1x256xf32> to vector<2x256xf32>
    %28 = arith.addf %25, %27 : vector<2x256xf32>
    %29 = arith.mulf %28, %28 : vector<2x256xf32>
    %cst_14 = arith.constant dense<0.000000e+00> : vector<2xf32>
    %30 = vector.multi_reduction <add>, %29, %cst_14 [1] : vector<2x256xf32> to vector<2xf32>
    %31 = vector.shape_cast %30 : vector<2xf32> to vector<2x1xf32>
    %cst_15 = arith.constant 1.000000e-24 : f32
    %32 = vector.broadcast %cst_15 : f32 to vector<2x1xf32>
    %33 = arith.maximumf %31, %32 : vector<2x1xf32>
    %34 = math.rsqrt %33 : vector<2x1xf32>
    %35 = vector.broadcast %34 : vector<2x1xf32> to vector<2x256xf32>
    %36 = arith.mulf %28, %35 : vector<2x256xf32>
    %c0_16 = arith.constant 0 : index
    %c0_17 = arith.constant 0 : index
    %37 = vector.load %arg7[%c0_16, %c0_17] : memref<2x256xf32, #tpu.memory_space<vmem>>, vector<2x256xf32>
    tpu.vector_store %arg7[%c0_16, %c0_17], %36 {strides = array<i32>} : memref<2x256xf32, #tpu.memory_space<vmem>>, vector<2x256xf32>,
    return
  }
  func.func @transform_0(%arg0: i32, %arg1: i32) -> (i32, i32) {
    %c0_i32 = arith.constant 0 : i32
    %c0_i32_0 = arith.constant 0 : i32
    return %arg0, %c0_i32 : i32, i32
  }
  func.func @transform_1(%arg0: i32, %arg1: i32) -> (i32, i32) {
    %c0_i32 = arith.constant 0 : i32
    %c0_i32_0 = arith.constant 0 : i32
    %c0_i32_1 = arith.constant 0 : i32
    return %c0_i32, %c0_i32_0 : i32, i32
  }
  func.func @transform_2(%arg0: i32, %arg1: i32) -> (i32, i32) {
    %c0_i32 = arith.constant 0 : i32
    %c0_i32_0 = arith.constant 0 : i32
    %c0_i32_1 = arith.constant 0 : i32
    return %c0_i32, %c0_i32_0 : i32, i32
  }
  func.func @transform_3(%arg0: i32, %arg1: i32) -> (i32, i32) {
    %c0_i32 = arith.constant 0 : i32
    %c0_i32_0 = arith.constant 0 : i32
    return %c0_i32, %arg1 : i32, i32
  }
  func.func @transform_4(%arg0: i32, %arg1: i32) -> (i32, i32) {
    %c0_i32 = arith.constant 0 : i32
    %c0_i32_0 = arith.constant 0 : i32
    return %c0_i32, %arg1 : i32, i32
  }
  func.func @transform_5(%arg0: i32, %arg1: i32) -> (i32, i32) {
    %c0_i32 = arith.constant 0 : i32
    return %arg0, %arg1 : i32, i32
  }
}

module attributes {stable_mosaic.version = 11 : i64} {
  func.func @_clip_loss_kernel(%arg0: i32, %arg1: memref<2x256xf32, #tpu.memory_space<vmem>>, %arg2: memref<2x256xf32, #tpu.memory_space<vmem>>, %arg3: memref<1x1xf32, #tpu.memory_space<vmem>>) attributes {dimension_semantics = [#tpu.dimension_semantics<arbitrary>], iteration_bounds = array<i64: 1>, scalar_prefetch = 0 : i64, scratch_operands = 0 : i64, tpu.core_type = #tpu.core_type<tc>, window_params = [{pipeline_mode = #tpu.pipeline_mode<synchronous>, transform_indices = @transform_0, window_bounds = array<i64: 2, 256>}, {pipeline_mode = #tpu.pipeline_mode<synchronous>, transform_indices = @transform_1, window_bounds = array<i64: 2, 256>}, {pipeline_mode = #tpu.pipeline_mode<synchronous>, transform_indices = @transform_2, window_bounds = array<i64: 1, 1>}]} {
    %c0 = arith.constant 0 : index
    %c0_0 = arith.constant 0 : index
    %0 = vector.load %arg1[%c0, %c0_0] : memref<2x256xf32, #tpu.memory_space<vmem>>, vector<2x256xf32>
    %c0_1 = arith.constant 0 : index
    %c0_2 = arith.constant 0 : index
    %1 = vector.load %arg2[%c0_1, %c0_2] : memref<2x256xf32, #tpu.memory_space<vmem>>, vector<2x256xf32>
    %2 = arith.mulf %1, %1 : vector<2x256xf32>
    %cst = arith.constant dense<0.000000e+00> : vector<2xf32>
    %3 = vector.multi_reduction <add>, %2, %cst [1] : vector<2x256xf32> to vector<2xf32>
    %4 = vector.shape_cast %3 : vector<2xf32> to vector<2x1xf32>
    %cst_3 = arith.constant 1.000000e-24 : f32
    %5 = vector.broadcast %cst_3 : f32 to vector<2x1xf32>
    %6 = arith.maximumf %4, %5 : vector<2x1xf32>
    %7 = math.rsqrt %6 : vector<2x1xf32>
    %8 = vector.broadcast %7 : vector<2x1xf32> to vector<2x256xf32>
    %9 = arith.mulf %1, %8 : vector<2x256xf32>
    %cst_4 = arith.constant dense<0.000000e+00> : vector<2x2xf32>
    %10 = tpu.matmul %0, %9, %cst_4 {dimension_numbers = #tpu.dot_dimension_numbers<[1], [1], [0], [0], [0, 0, 1, 0], [], []>} : vector<2x256xf32>, vector<2x256xf32>, vector<2x2xf32> -> vector<2x2xf32>
    %cst_5 = arith.constant 14.2857141 : f32
    %11 = vector.broadcast %cst_5 : f32 to vector<2x2xf32>
    %12 = arith.mulf %10, %11 : vector<2x2xf32>
    %13 = tpu.iota {dimensions = array<i32: 0>} : vector<2x2xi32>
    %14 = tpu.iota {dimensions = array<i32: 1>} : vector<2x2xi32>
    %15 = arith.cmpi eq, %13, %14 : vector<2x2xi32>
    %cst_6 = arith.constant 0.000000e+00 : f32
    %16 = vector.broadcast %cst_6 : f32 to vector<2x2xf32>
    %17 = arith.select %15, %12, %16 : vector<2x2xi1>, vector<2x2xf32>
    %18 = vector.shape_cast %17 : vector<2x2xf32> to vector<1x2x2xf32>
    %cst_7 = arith.constant dense<0.000000e+00> : vector<1xf32>
    %19 = vector.multi_reduction <add>, %18, %cst_7 [1, 2] : vector<1x2x2xf32> to vector<1xf32>
    %20 = vector.shape_cast %19 : vector<1xf32> to vector<1x1x1xf32>
    %21 = vector.extract %20[0, 0, 0] : f32 from vector<1x1x1xf32>
    %cst_8 = arith.constant dense<0xFF800000> : vector<2xf32>
    %22 = vector.multi_reduction <maximumf>, %12, %cst_8 [1] : vector<2x2xf32> to vector<2xf32>
    %23 = vector.shape_cast %22 : vector<2xf32> to vector<2x1xf32>
    %24 = vector.broadcast %23 : vector<2x1xf32> to vector<2x2xf32>
    %25 = arith.subf %12, %24 : vector<2x2xf32>
    %26 = math.exp %25 : vector<2x2xf32>
    %cst_9 = arith.constant dense<0.000000e+00> : vector<2xf32>
    %27 = vector.multi_reduction <add>, %26, %cst_9 [1] : vector<2x2xf32> to vector<2xf32>
    %28 = vector.shape_cast %27 : vector<2xf32> to vector<2x1xf32>
    %29 = math.log %28 : vector<2x1xf32>
    %30 = arith.addf %23, %29 : vector<2x1xf32>
    %cst_10 = arith.constant dense<0xFF800000> : vector<2xf32>
    %31 = vector.multi_reduction <maximumf>, %12, %cst_10 [0] : vector<2x2xf32> to vector<2xf32>
    %32 = vector.shape_cast %31 : vector<2xf32> to vector<1x2xf32>
    %33 = vector.broadcast %32 : vector<1x2xf32> to vector<2x2xf32>
    %34 = arith.subf %12, %33 : vector<2x2xf32>
    %35 = math.exp %34 : vector<2x2xf32>
    %cst_11 = arith.constant dense<0.000000e+00> : vector<2xf32>
    %36 = vector.multi_reduction <add>, %35, %cst_11 [0] : vector<2x2xf32> to vector<2xf32>
    %37 = vector.shape_cast %36 : vector<2xf32> to vector<1x2xf32>
    %38 = math.log %37 : vector<1x2xf32>
    %39 = arith.addf %32, %38 : vector<1x2xf32>
    %40 = vector.shape_cast %30 : vector<2x1xf32> to vector<1x2x1xf32>
    %cst_12 = arith.constant dense<0.000000e+00> : vector<1xf32>
    %41 = vector.multi_reduction <add>, %40, %cst_12 [1, 2] : vector<1x2x1xf32> to vector<1xf32>
    %42 = vector.shape_cast %41 : vector<1xf32> to vector<1x1x1xf32>
    %43 = vector.extract %42[0, 0, 0] : f32 from vector<1x1x1xf32>
    %44 = arith.subf %43, %21 : f32
    %45 = vector.shape_cast %39 : vector<1x2xf32> to vector<1x1x2xf32>
    %cst_13 = arith.constant dense<0.000000e+00> : vector<1xf32>
    %46 = vector.multi_reduction <add>, %45, %cst_13 [1, 2] : vector<1x1x2xf32> to vector<1xf32>
    %47 = vector.shape_cast %46 : vector<1xf32> to vector<1x1x1xf32>
    %48 = vector.extract %47[0, 0, 0] : f32 from vector<1x1x1xf32>
    %49 = arith.subf %48, %21 : f32
    %50 = arith.addf %44, %49 : f32
    %cst_14 = arith.constant 5.000000e-01 : f32
    %51 = arith.mulf %cst_14, %50 : f32
    %cst_15 = arith.constant 2.000000e+00 : f32
    %52 = arith.divf %51, %cst_15 : f32
    %53 = vector.broadcast %52 : f32 to vector<1x1xf32>
    %c0_16 = arith.constant 0 : index
    %c0_17 = arith.constant 0 : index
    %54 = vector.load %arg3[%c0_16, %c0_17] : memref<1x1xf32, #tpu.memory_space<vmem>>, vector<1x1xf32>
    tpu.vector_store %arg3[%c0_16, %c0_17], %53 {strides = array<i32>} : memref<1x1xf32, #tpu.memory_space<vmem>>, vector<1x1xf32>,
    return
  }
  func.func @transform_0(%arg0: i32) -> (i32, i32) {
    %c0_i32 = arith.constant 0 : i32
    %c0_i32_0 = arith.constant 0 : i32
    %c0_i32_1 = arith.constant 0 : i32
    return %c0_i32, %c0_i32_0 : i32, i32
  }
  func.func @transform_1(%arg0: i32) -> (i32, i32) {
    %c0_i32 = arith.constant 0 : i32
    %c0_i32_0 = arith.constant 0 : i32
    %c0_i32_1 = arith.constant 0 : i32
    return %c0_i32, %c0_i32_0 : i32, i32
  }
  func.func @transform_2(%arg0: i32) -> (i32, i32) {
    %c0_i32 = arith.constant 0 : i32
    %c0_i32_0 = arith.constant 0 : i32
    %c0_i32_1 = arith.constant 0 : i32
    return %c0_i32, %c0_i32_0 : i32, i32
  }
}

</mosaic_0001>

<bundles_post_ra>
// kernel: blip_cir_visual_forward.11
= control target key start
LH: loop header
LB: loop body
LE: loop exit
PB: predicated region body
PF: predicated region fallthrough
CT: control target
= control target key end

     0   :  { %v211_v0 = vmov 0   ;;  %vm121_vm0 = vcmask 523264   ;;  %s280_s1 = inlined_call_operand.vmem [shape: bf16[192,128], index: 1, kind: input, shape index: {}]   ;;  %s281_s0 = inlined_call_operand.vmem [shape: f32[8,192], index: 0, kind: input, shape index: {}]   ;;  %s282_s2 = inlined_call_operand.vmem [shape: f32[1,128], index: 2, kind: input, shape index: {}]   ;;  %s283_s3 = inlined_call_operand.vmem [shape: f32[8,128], index: 3, kind: output, shape index: {}]  }
   0x1   :  { %125 = vmatprep.subr.bf16.mxu0 %v211_v0  ;;  %v199_v1 = vld [vmem:[%s280_s1] sm:$0xff]   ;;  %v200_v2 = vld [vmem:[%s280_s1 + $0x8] sm:$0xff]   ;;  %v201_v3 = vld [vmem:[%s280_s1 + $0x10] sm:$0xff]  }
   0x2   :  { %126 = vmatpush1.bf16.msra.mxu0 %v199_v1  ;;  %v202_v4 = vld [vmem:[%s280_s1 + $0x18] sm:$0xff]   ;;  %v22_v5 = vld [vmem:[%s281_s0 + $0x8] sm:$0xff]  ;;  %v203_v7 = vld [vmem:[%s280_s1 + $0x20] sm:$0xff]  }
   0x3   :  { %127 = vmatprep.subr.bf16.mxu0 %v211_v0  ;;  %v24_v6 = vpack.c.bf16 %v22_v5, %v22_v5  ;;  %v204_v8 = vld [vmem:[%s280_s1 + $0x28] sm:$0xff]   ;;  %v205_v9 = vld [vmem:[%s280_s1 + $0x30] sm:$0xff]   ;;  %v206_v10 = vld [vmem:[%s280_s1 + $0x38] sm:$0xff]  }
   0x4   :  { %v207_v11 = vld [vmem:[%s280_s1 + $0x40] sm:$0xff]   ;;  %v208_v12 = vld [vmem:[%s280_s1 + $0x48] sm:$0xff]   ;;  %v209_v13 = vld [vmem:[%s280_s1 + $0x50] sm:$0xff]  }
   0x5   :  { %196 = vmatprep.mubr.msk.bf16.mxu0 %vm121_vm0, %v24_v6  ;;  %v210_v14 = vld [vmem:[%s280_s1 + $0x58] sm:$0xff]   ;;  %v21_v15 = vld [vmem:[%s281_s0] sm:$0xff] }
   0x6   :  { %128 = vmatpush1.bf16.msra.mxu0 %v200_v2  ;;  %v23_v16 = vpack.c.bf16 %v21_v15, %v21_v15  ;;  %v197_v17 = vld [vmem:[%s282_s2] ss:$0 sm:$0xff] }
   0x7   :  { %129 = vmatprep.subr.bf16.mxu0 %v211_v0 }
   0xa   :  { %130 = vmatpush1.bf16.msra.mxu0 %v201_v3 }
   0xb   :  { %131 = vmatprep.subr.bf16.mxu0 %v211_v0 }
   0xe   :  { %132 = vmatpush1.bf16.msra.mxu0 %v202_v4 }
   0xf   :  { %133 = vmatprep.subr.bf16.mxu0 %v211_v0 }
  0x12   :  { %134 = vmatpush1.bf16.msra.mxu0 %v203_v7 }
  0x13   :  { %135 = vmatprep.subr.bf16.mxu0 %v211_v0 }
  0x16   :  { %136 = vmatpush1.bf16.msra.mxu0 %v204_v8 }
  0x17   :  { %137 = vmatprep.subr.bf16.mxu0 %v211_v0 }
  0x1a   :  { %138 = vmatpush1.bf16.msra.mxu0 %v205_v9 }
  0x1b   :  { %139 = vmatprep.subr.bf16.mxu0 %v211_v0 }
  0x1e   :  { %140 = vmatpush1.bf16.msra.mxu0 %v206_v10 }
  0x1f   :  { %141 = vmatprep.subr.bf16.mxu0 %v211_v0 }
  0x22   :  { %142 = vmatpush1.bf16.msra.mxu0 %v207_v11 }
  0x23   :  { %143 = vmatprep.subr.bf16.mxu0 %v211_v0 }
  0x26   :  { %144 = vmatpush1.bf16.msra.mxu0 %v208_v12 }
  0x27   :  { %145 = vmatprep.subr.bf16.mxu0 %v211_v0 }
  0x2a   :  { %146 = vmatpush1.bf16.msra.mxu0 %v209_v13 }
  0x2b   :  { %147 = vmatprep.subr.bf16.mxu0 %v211_v0 }
  0x2e   :  { %148 = vmatpush1.bf16.msra.mxu0 %v210_v14 }
  0x31   :  { %158 = vmatmul.mubr.bf16.vlgmr.msra.gmra.mrb[0].mxu0 %v23_v16 }
 0x104   :  { %v159_v18 = vpop.f32.mrb[0].mxu0 }
 0x105   :  { %v178_v19 = vadd.f32 %v197_v17, %v159_v18  ;;  %v161_v20 = vpop.f32.mrb[1].mxu0 }
 0x106   :  { %v162_v21 = vpop.f32.mrb[2].mxu0 }
 0x107   :  { %179 = vst [vmem:[%s283_s3] sm:$0xff] %v178_v19  ;;  %v163_v22 = vpop.f32.mrb[3].mxu0 }

// kernel: blip_cir_visual_forward.14
= control target key start
LH: loop header
LB: loop body
LE: loop exit
PB: predicated region body
PF: predicated region fallthrough
CT: control target
= control target key end

     0   :  { %v217_v0 = vmov 0.0   ;;  %vm218_vm0 = vmmov 0   ;;  %s286_s1 = inlined_call_operand.vmem [shape: bf16[128,128], index: 1, kind: input, shape index: {}]   ;;  %s287_s0 = inlined_call_operand.vmem [shape: bf16[16,128], index: 0, kind: input, shape index: {}]   ;;  %s288_s2 = inlined_call_operand.vmem [shape: f32[1,128], index: 2, kind: input, shape index: {}]   ;;  %s289_s3 = inlined_call_operand.vmem [shape: f32[16,128], index: 3, kind: input, shape index: {}]   ;;  %s290_s4 = inlined_call_operand.vmem [shape: f32[16,128], index: 4, kind: output, shape index: {}]  }
   0x1   :  { %186 = vmatprep.subr.bf16.mxu0 %v217_v0  ;;  %v208_v1 = vld [vmem:[%s286_s1] sm:$0xff]   ;;  %202 = vmatprep.mubr.msk.bf16.mxu0 %vm218_vm0, %v217_v0  ;;  %v209_v2 = vld [vmem:[%s286_s1 + $0x8] sm:$0xff]   ;;  %v210_v3 = vld [vmem:[%s286_s1 + $0x10] sm:$0xff]  }
   0x2   :  { %187 = vmatpush3.bf16.msra.mxu0 %v208_v1  ;;  %v211_v4 = vld [vmem:[%s286_s1 + $0x18] sm:$0xff]   ;;  %v212_v5 = vld [vmem:[%s286_s1 + $0x20] sm:$0xff]   ;;  %v213_v6 = vld [vmem:[%s286_s1 + $0x28] sm:$0xff]  }
   0x3   :  { %188 = vmatprep.subr.bf16.mxu0 %v217_v0  ;;  %v214_v7 = vld [vmem:[%s286_s1 + $0x30] sm:$0xff]   ;;  %v215_v8 = vld [vmem:[%s286_s1 + $0x38] sm:$0xff]   ;;  %v216_v9 = vld [vmem:[%s287_s0] sm:$0xff]  }
   0x4   :  { %v176_v10 = vld [vmem:[%s288_s2] ss:$0 sm:$0xff]  ;;  %v158_v16 = vld [vmem:[%s289_s3 + $0x8] sm:$0xff] }
   0x5   :  { %v157_v12 = vld [vmem:[%s289_s3] sm:$0xff] }
   0x6   :  { %189 = vmatpush3.bf16.msra.mxu0 %v209_v2 }
   0x7   :  { %190 = vmatprep.subr.bf16.mxu0 %v217_v0 }
   0xa   :  { %191 = vmatpush3.bf16.msra.mxu0 %v210_v3 }
   0xb   :  { %192 = vmatprep.subr.bf16.mxu0 %v217_v0 }
   0xe   :  { %193 = vmatpush3.bf16.msra.mxu0 %v211_v4 }
   0xf   :  { %194 = vmatprep.subr.bf16.mxu0 %v217_v0 }
  0x12   :  { %195 = vmatpush3.bf16.msra.mxu0 %v212_v5 }
  0x13   :  { %196 = vmatprep.subr.bf16.mxu0 %v217_v0 }
  0x16   :  { %197 = vmatpush3.bf16.msra.mxu0 %v213_v6 }
  0x17   :  { %198 = vmatprep.subr.bf16.mxu0 %v217_v0 }
  0x1a   :  { %199 = vmatpush3.bf16.msra.mxu0 %v214_v7 }
  0x1b   :  { %200 = vmatprep.subr.bf16.mxu0 %v217_v0 }
  0x1e   :  { %201 = vmatpush3.bf16.msra.mxu0 %v215_v8 }
  0x21   :  { %203 = vmatmul.mubr.bf16.vlgmr.msra.gmra.mrb[0].mxu0 %v216_v9 }
  0xf4   :  { %v132_v11 = vpop.f32.mrb[0].mxu0 }
  0xf5   :  { %v155_v13 = vadd.f32 %v176_v10, %v132_v11  ;;  %v204_v14 = vpop.f32.mrb[1].mxu0 }
  0xf6   :  { %v135_v15 = vpop.f32.mrb[2].mxu0 }
  0xf7   :  { %v159_v17 = vadd.f32 %v157_v12, %v155_v13  ;;  %v156_v18 = vadd.f32 %v176_v10, %v135_v15  ;;  %v205_v19 = vpop.f32.mrb[3].mxu0 }
  0xf9   :  { %161 = vst [vmem:[%s290_s4] sm:$0xff] %v159_v17  ;;  %v160_v20 = vadd.f32 %v158_v16, %v156_v18 }
  0xfb   :  { %162 = vst [vmem:[%s290_s4 + $0x8] sm:$0xff] %v160_v20 }

// kernel: blip_cir_visual_forward.12
= control target key start
LH: loop header
LB: loop body
LE: loop exit
PB: predicated region body
PF: predicated region fallthrough
CT: control target
= control target key end

     0   :  { %v456_v3 = vmov 0.0   ;;  %v457_v30 = vmov 0   ;;  %vm458_vm0 = vmmov 0   ;;  %v99_v53 = vlaneseq  ;;  %s607_s0 = inlined_call_operand.vmem [shape: f32[16,128], index: 0, kind: input, shape index: {}]   ;;  %s608_s3 = inlined_call_operand.vmem [shape: bf16[128,384], index: 3, kind: input, shape index: {}]   ;;  %s609_s1 = inlined_call_operand.vmem [shape: f32[1,128], index: 1, kind: input, shape index: {}]   ;;  %s610_s2 = inlined_call_operand.vmem [shape: f32[1,128], index: 2, kind: input, shape index: {}]   ;;  %s611_s4 = inlined_call_operand.vmem [shape: f32[1,384], index: 4, kind: input, shape index: {}]   ;;  %s612_s5 = inlined_call_operand.vmem [shape: bf16[16,384], index: 5, kind: output, shape index: {}]  }
   0x1   :  { %v21_v0 = vld [vmem:[%s607_s0] sm:$0xff]  ;;  %v22_v1 = vld [vmem:[%s607_s0 + $0x8] sm:$0xff]  ;;  %397 = vmatprep.subr.bf16.mxu1 %v456_v3  ;;  %v430_v18 = vld [vmem:[%s608_s3 + $0x30] ss:$12 sps:$4 sm:$0xff]   ;;  %274 = vmatprep.mubr.bf16.mxu0 %v457_v30 }
   0x2   :  { %23 = vadd.xlane.f32.xlu0 %v21_v0  ;;  %v420_v2 = vld [vmem:[%s608_s3 + $0x4] ss:$12 sps:$4 sm:$0xff]   ;;  %v422_v4 = vld [vmem:[%s608_s3] ss:$12 sps:$4 sm:$0xff]   ;;  %v423_v5 = vld [vmem:[%s608_s3 + $0x8] ss:$12 sps:$4 sm:$0xff]   ;;  %413 = vmatprep.mubr.msk.bf16.mxu1 %vm458_vm0, %v456_v3 }
   0x3   :  { %242 = vmatprep.subr.bf16.mxu0 %v420_v2  ;;  %v424_v6 = vld [vmem:[%s608_s3 + $0x1c] ss:$12 sps:$4 sm:$0xff]   ;;  %398 = vmatpush3.bf16.msra.mxu1 %v423_v5  ;;  %v426_v15 = vld [vmem:[%s608_s3 + $0x18] ss:$12 sps:$4 sm:$0xff]   ;;  %v427_v16 = vld [vmem:[%s608_s3 + $0x20] ss:$12 sps:$4 sm:$0xff]  }
   0x4   :  { %243 = vmatpush1.bf16.msra.mxu0 %v422_v4  ;;  %399 = vmatprep.subr.bf16.mxu1 %v456_v3  ;;  %v428_v17 = vld [vmem:[%s608_s3 + $0x34] ss:$12 sps:$4 sm:$0xff]   ;;  %v431_v19 = vld [vmem:[%s608_s3 + $0x38] ss:$12 sps:$4 sm:$0xff]   ;;  %v435_v22 = vld [vmem:[%s608_s3 + $0x50] ss:$12 sps:$4 sm:$0xff]  }
   0x5   :  { %244 = vmatprep.subr.bf16.mxu0 %v424_v6  ;;  %v432_v20 = vld [vmem:[%s608_s3 + $0x4c] ss:$12 sps:$4 sm:$0xff]   ;;  %v434_v21 = vld [vmem:[%s608_s3 + $0x48] ss:$12 sps:$4 sm:$0xff]   ;;  %v436_v23 = vld [vmem:[%s608_s3 + $0x64] ss:$12 sps:$4 sm:$0xff]  }
   0x6   :  { %25 = vadd.xlane.f32.xlu0 %v22_v1  ;;  %v438_v24 = vld [vmem:[%s608_s3 + $0x60] ss:$12 sps:$4 sm:$0xff]   ;;  %v439_v25 = vld [vmem:[%s608_s3 + $0x68] ss:$12 sps:$4 sm:$0xff]   ;;  %v442_v27 = vld [vmem:[%s608_s3 + $0x78] ss:$12 sps:$4 sm:$0xff]  }
   0x7   :  { %400 = vmatpush3.bf16.msra.mxu1 %v427_v16  ;;  %v440_v26 = vld [vmem:[%s608_s3 + $0x7c] ss:$12 sps:$4 sm:$0xff]   ;;  %v443_v28 = vld [vmem:[%s608_s3 + $0x80] ss:$12 sps:$4 sm:$0xff]   ;;  %v447_v32 = vld [vmem:[%s608_s3 + $0x98] ss:$12 sps:$4 sm:$0xff]  }
   0x8   :  { %245 = vmatpush1.bf16.msra.mxu0 %v426_v15  ;;  %401 = vmatprep.subr.bf16.mxu1 %v456_v3  ;;  %v444_v29 = vld [vmem:[%s608_s3 + $0x94] ss:$12 sps:$4 sm:$0xff]   ;;  %v446_v31 = vld [vmem:[%s608_s3 + $0x90] ss:$12 sps:$4 sm:$0xff]   ;;  %v448_v33 = vld [vmem:[%s608_s3 + $0xac] ss:$12 sps:$4 sm:$0xff]  }
   0x9   :  { %246 = vmatprep.subr.bf16.mxu0 %v428_v17  ;;  %v450_v34 = vld [vmem:[%s608_s3 + $0xa8] ss:$12 sps:$4 sm:$0xff]   ;;  %v451_v35 = vld [vmem:[%s608_s3 + $0xb0] ss:$12 sps:$4 sm:$0xff]   ;;  %v354_v44 = vld [vmem:[%s609_s1] ss:$0 sm:$0xff] }
   0xa   :  { %v355_v48 = vld [vmem:[%s610_s2] ss:$0 sm:$0xff]  ;;  %v100_v54 = vshrl.u32 %v99_v53, 7 }
   0xb   :  { %402 = vmatpush3.bf16.msra.mxu1 %v431_v19  ;;  %v97_v57 = vld [vmem:[%s611_s4] sm:$0x7] }
   0xc   :  { %247 = vmatpush1.bf16.msra.mxu0 %v430_v18  ;;  %403 = vmatprep.subr.bf16.mxu1 %v456_v3  ;;  %v101_v55 = vsub.s32 0, %v100_v54  ;;  %v109_v56 = vsub.s32 2, %v100_v54  ;;  %v105_v58 = vsub.s32 1, %v100_v54 }
   0xd   :  { %248 = vmatprep.subr.bf16.mxu0 %v432_v20 }
   0xe   :  { %v102_v59 = vrot.slane %v97_v57, %v101_v55  ;;  %v110_v60 = vrot.slane %v97_v57, %v109_v56  ;;  %v106_v61 = vrot.slane %v97_v57, %v105_v58 }
   0xf   :  { %404 = vmatpush3.bf16.msra.mxu1 %v435_v22 }
  0x10   :  { %249 = vmatpush1.bf16.msra.mxu0 %v434_v21  ;;  %405 = vmatprep.subr.bf16.mxu1 %v456_v3 }
  0x11   :  { %250 = vmatprep.subr.bf16.mxu0 %v436_v23 }
  0x13   :  { %406 = vmatpush3.bf16.msra.mxu1 %v439_v25 }
  0x14   :  { %251 = vmatpush1.bf16.msra.mxu0 %v438_v24  ;;  %407 = vmatprep.subr.bf16.mxu1 %v456_v3 }
  0x15   :  { %252 = vmatprep.subr.bf16.mxu0 %v440_v26 }
  0x17   :  { %408 = vmatpush3.bf16.msra.mxu1 %v443_v28 }
  0x18   :  { %253 = vmatpush1.bf16.msra.mxu0 %v442_v27  ;;  %409 = vmatprep.subr.bf16.mxu1 %v456_v3 }
  0x19   :  { %254 = vmatprep.subr.bf16.mxu0 %v444_v29 }
  0x1b   :  { %410 = vmatpush3.bf16.msra.mxu1 %v447_v32 }
  0x1c   :  { %255 = vmatpush1.bf16.msra.mxu0 %v446_v31  ;;  %411 = vmatprep.subr.bf16.mxu1 %v456_v3 }
  0x1d   :  { %256 = vmatprep.subr.bf16.mxu0 %v448_v33 }
  0x1f   :  { %412 = vmatpush3.bf16.msra.mxu1 %v451_v35 }
  0x20   :  { %257 = vmatpush1.bf16.msra.mxu0 %v450_v34 }
  0x8f   :  { %v24_v7 = vpop.xlane.xlu0 %23 }
  0x90   :  { %v28_v8 = vmul.f32 0.0078125, %v24_v7 }
  0x92   :  { %v509_v9 = vsub.f32 %v21_v0, %v28_v8 }
  0x93   :  { %v26_v10 = vpop.xlane.xlu0 %25 }
  0x94   :  { %v29_v11 = vmul.f32 0.0078125, %v26_v10  ;;  %v32_v12 = vmul.f32 %v509_v9, %v509_v9 }
  0x96   :  { %v513_v13 = vsub.f32 %v22_v1, %v29_v11  ;;  %34 = vadd.xlane.f32.xlu1 %v32_v12 }
  0x98   :  { %v33_v14 = vmul.f32 %v513_v13, %v513_v13 }
  0x9a   :  { %36 = vadd.xlane.f32.xlu1 %v33_v14 }
 0x123   :  { %v35_v36 = vpop.xlane.xlu1 %34 }
 0x124   :  { %v38_v37 = vmul.f32 0.0078125, %v35_v36 }
 0x126   :  { %v40_v38 = vadd.f32 1e-06, %v38_v37 }
 0x127   :  { %v37_v39 = vpop.xlane.xlu1 %36 }
 0x128   :  { %452 = vrsqrt.f32 %v40_v38  ;;  %v39_v40 = vmul.f32 0.0078125, %v37_v39 }
 0x12a   :  { %v41_v41 = vadd.f32 1e-06, %v39_v40 }
 0x12c   :  { %454 = vrsqrt.f32 %v41_v41 }
 0x132   :  { %v453_v42 = vpop.eup %452 }
 0x133   :  { %v44_v43 = vmul.f32 %v453_v42, %v509_v9 }
 0x135   :  { %v53_v47 = vmul.f32 %v354_v44, %v44_v43 }
 0x136   :  { %v455_v45 = vpop.eup %454 }
 0x137   :  { %v45_v46 = vmul.f32 %v455_v45, %v513_v13  ;;  %v62_v50 = vadd.f32 %v355_v48, %v53_v47 }
 0x139   :  { %v54_v49 = vmul.f32 %v354_v44, %v45_v46 }
 0x13b   :  { %v63_v51 = vadd.f32 %v355_v48, %v54_v49 }
 0x13d   :  { %v64_v52 = vpack.c.bf16 %v63_v51, %v62_v50 }
 0x13f   :  { %275 = vmatmul.mubr.bf16.vlgmr.msra.gmra.mrb[0].mxu0 %v64_v52  ;;  %414 = vmatmul.mubr.bf16.vlgmr.msra.gmra.mrb[0].mxu1 %v64_v52 }
 0x212   :  { %v276_v62 = vpop.f32.mrb[0].mxu0  ;;  %v319_v63 = vpop.f32.mrb[0].mxu1 }
 0x213   :  { %v277_v0 = vadd.f32 %v276_v62, %v102_v59  ;;  %v320_v1 = vadd.f32 %v319_v63, %v110_v60  ;;  %v278_v2 = vpop.f32.mrb[1].mxu0  ;;  %v415_v3 = vpop.f32.mrb[1].mxu1 }
 0x214   :  { %v279_v4 = vadd.f32 %v278_v2, %v106_v61  ;;  %v280_v5 = vpop.f32.mrb[2].mxu0  ;;  %v322_v6 = vpop.f32.mrb[2].mxu1 }
 0x215   :  { %v385_v7 = vpack.c.bf16 %v320_v1, %v320_v1  ;;  %v281_v8 = vadd.f32 %v280_v5, %v102_v59  ;;  %v323_v9 = vadd.f32 %v322_v6, %v110_v60  ;;  %v282_v10 = vpop.f32.mrb[3].mxu0  ;;  %v416_v11 = vpop.f32.mrb[3].mxu1 }
 0x216   :  { %v384_v12 = vpack.c.bf16 %v279_v4, %v277_v0  ;;  %v283_v13 = vadd.f32 %v282_v10, %v106_v61 }
 0x217   :  { %347 = vst [vmem:[%s612_s5 + $0x8] sm:$0xf] %v385_v7  ;;  %v387_v14 = vpack.c.bf16 %v323_v9, %v323_v9 }
 0x218   :  { %346 = vst [vmem:[%s612_s5] sm:$0xff] %v384_v12  ;;  %v386_v15 = vpack.c.bf16 %v283_v13, %v281_v8 }
 0x219   :  { %349 = vst [vmem:[%s612_s5 + $0x14] sm:$0xf] %v387_v14 }
 0x21a   :  { %348 = vst [vmem:[%s612_s5 + $0xc] sm:$0xff] %v386_v15 }

// kernel: blip_cir_visual_forward.13
= control target key start
LH: loop header
LB: loop body
LE: loop exit
PB: predicated region body
PF: predicated region fallthrough
CT: control target
= control target key end

     0   :  { %s786_s6 = smov 0   ;;  %s891_s0 = inlined_call_operand.vmem [shape: bf16[2,8,384], index: 0, kind: input, shape index: {}]   ;;  %s892_s1 = inlined_call_operand.vmem [shape: bf16[2,8,128], index: 1, kind: output, shape index: {}]  }
   0x1 LB: > { %s646_s7 = sadd.s32 4294967295, %s769_s6   ;;  %p650_p0 = scmp.ge.s32.totalorder %s769_s6, 1  ;;  %s769_s6 = sphi %s786_s6, %s11_s6  }
   0x2   : > { %p87_p1 = scmp.lt.s32.totalorder %s769_s6, 3 }
   0x4   : > { %p88_p2 = pnand %p650_p0, %p87_p1 }
   0x5   : > { %p106_p3 = scmp.lt.s32.totalorder (!%p88_p2), %s646_s7, 1  ;;  %v771_v0 = vmov (!%p88_p2), 0.0   ;;  %vm772_vm0 = vmmov (!%p88_p2), 0   ;;  %vm124_vm1 = vcmask (!%p88_p2), 261120   ;;  %v118_v4 = vlaneseq (!%p88_p2)  ;;  %s773_s12 = smov (!%p88_p2), 96  }
   0x6   : > { %91 = sbr.rel (%p88_p2) target bundleno = 1482 (0x5ca), region = 24  ;;  %682 = vmatprep.subr.bf16.mxu0 (!%p88_p2), %v771_v0  ;;  %684 = vmatprep.mubr.msk.bf16.mxu0 (!%p88_p2), %vm772_vm0, %v771_v0  ;;  %vm173_vm3 = vcmask (!%p88_p2), 64512   ;;  %s774_s13 = smov (!%p88_p2), 64   ;;  %vm189_vm4 = vcmask (!%p88_p2), 1043456   ;;  %vm587_vm5 = vcmask (!%p88_p2), 523264   ;;  %vm589_vm6 = vcmask (!%p88_p2), 785408  }
   0x7   : > { %688 = vmatprep.subr.bf16.mxu1 (!%p88_p2), %v771_v0  ;;  %690 = vmatprep.mubr.msk.bf16.mxu1 (!%p88_p2), %vm772_vm0, %v771_v0  ;;  %v814_v5 = vand.u32 (!%p88_p2), 127, %v118_v4  ;;  %s775_s14 = smov (!%p88_p2), 32  }
   0x9   : > { %vm120_vm2 = vcmp.lt.s32.totalorder (!%p88_p2), %v814_v5, 5 }
   0xd   : > { %s894_s7 = smov (!%p106_p3, %s646_s7), 1 }
   0xe   : > { %s730_s8 = smul.u32 12, %s894_s7  ;;  %s652_s15 = sshll.u32 %s894_s7, 2 }
   0xf   : > { %s114_s18 = scalar_lea.vmem %s892_s1, %s652_s15 }
  0x10   : > { %s806_s11 = scalar_lea.vmem %s891_s0, %s730_s8 }
  0x11   : > { %v116_v1 = vld [vmem:[%s806_s11] sm:$0xff]  ;;  %v827_v19 = vld [vmem:[%s806_s11 + $0x8] sm:$0xf] }
  0x12   : > { %v653_v2 = vcombine.high %v116_v1, %v116_v1  ;;  %v656_v13 = vcombine.low %v116_v1, %v116_v1  ;;  %v191_v20 = vsel %vm189_vm4, %v827_v19, 0 }
  0x13   : > { %689 = vmatpush3.bf16.msra.mxu1 %v191_v20 }
  0x14   : > { %v129_v3 = vsel %vm124_vm1, %v653_v2, 0  ;;  %237 = vrot.lane.b32.xlu1 %v653_v2, %s773_s12  ;;  %694 = vmatprep.subr.bf16.mxu1 %v771_v0 }
  0x15   : > { %683 = vmatpush3.bf16.xpose.msra.mxu0 %v129_v3 }
  0x16   : > { %700 = vmatprep.subr.bf16.mxu0 %v771_v0 }
  0x18   : > { %235 = vrot.lane.b32.xlu1 %v656_v13, %s773_s12 }
  0x1c   : > { %685 = vmatmul.mubr.msk.bf16.vlgmr.msra.gmra.mrb[0].mxu0 %vm124_vm1, %v116_v1  ;;  %350 = vrot.lane.b32.xlu1 %v656_v13, %s774_s13 }
  0x1d   : > { %702 = vmatprep.mubr.msk.bf16.mxu0 %vm772_vm0, %v771_v0 }
  0x20   : > { %464 = vrot.lane.b32.xlu1 %v653_v2, %s775_s14 }
  0x24   : > { %462 = vrot.lane.b32.xlu1 %v656_v13, %s775_s14 }
  0x86   : > { %v238_v23 = vpop.permute.xlu1 %237 }
  0x87   : > { %v243_v25 = vsel %vm124_vm1, %v238_v23, 0 }
  0x8a   : > { %v236_v27 = vpop.permute.xlu1 %235 }
  0x8e   : > { %v351_v29 = vpop.permute.xlu1 %350 }
  0x92   : > { %v465_v31 = vpop.permute.xlu1 %464 }
  0x93   : > { %v470_v32 = vsel %vm124_vm1, %v465_v31, 0 }
  0x96   : > { %v463_v33 = vpop.permute.xlu1 %462 }
  0xef   : > { %v165_v6 = vpop.f32.mrb[0].mxu0 }
  0xf0   : > { %v171_v7 = vmul.f32 0.17677669, %v165_v6  ;;  %v686_v8 = vpop.f32.mrb[1].mxu0  ;;  %v658_v6 = vcombine.low %v827_v19, %v827_v19 }
  0xf1   : > { %v168_v9 = vpop.f32.mrb[2].mxu0 }
  0xf2   : > { %v687_v10 = vpop.f32.mrb[3].mxu0  ;;  %v172_v11 = vsel %vm120_vm2, %v171_v7, -1e+30 }
  0xf3   : > { %v174_v12 = vsel %vm173_vm3, %v172_v11, -inf }
  0xf4   : > { %175 = vmax.xlane.f32.xlu0 %v174_v12 }
 0x181   : > { %v176_v14 = vpop.xlane.xlu0 %175 }
 0x182   : > { %v177_v15 = vsub.f32 %v172_v11, %v176_v14 }
 0x184   : > { %v178_v16 = vmul.f32 1.442695, %v177_v15 }
 0x186   : > { %747 = vpow2.f32 %v178_v16 }
 0x190   : > { %v748_v17 = vpop.eup %747 }
 0x191   : > { %v180_v18 = vsel %vm173_vm3, %v748_v17, 0.0 }
 0x192   : > { %181 = vadd.xlane.f32.xlu0 %v180_v18 }
 0x1a8   : > { %352 = vrot.lane.b32.xlu0 %v653_v2, %s774_s13 }
 0x21f   : > { %v182_v21 = vpop.xlane.xlu0 %181 }
 0x220   : > { %749 = vrcp.f32 %v182_v21 }
 0x223   : > { %v353_v28 = vpop.permute.xlu0 %352 }
 0x224   : > { %v358_v30 = vsel %vm124_vm1, %v353_v28, 0 }
 0x22a   : > { %v750_v22 = vpop.eup %749 }
 0x22b   : > { %v184_v24 = vmul.f32 %v750_v22, %v748_v17 }
 0x22d   : > { %v185_v26 = vpack.c.bf16 %v184_v24, %v184_v24 }
 0x22f   : > { %691 = vmatmul.mubr.msk.bf16.vlgmr.msra.gmra.mrb[0].mxu1 %vm173_vm3, %v185_v26 }
 0x230   : > { %695 = vmatpush3.bf16.xpose.msra.mxu1 %v243_v25  ;;  %696 = vmatprep.mubr.msk.bf16.mxu1 %vm772_vm0, %v771_v0 }
 0x231   : > { %706 = vmatprep.subr.bf16.mxu1 %v771_v0 }
 0x237   : > { %697 = vmatmul.mubr.msk.bf16.vlgmr.msra.gmra.mrb[4].mxu1 %vm124_vm1, %v236_v27 }
 0x238   : > { %707 = vmatpush3.bf16.xpose.msra.mxu1 %v358_v30  ;;  %708 = vmatprep.mubr.msk.bf16.mxu1 %vm772_vm0, %v771_v0 }
 0x239   : > { %718 = vmatprep.subr.bf16.mxu1 %v771_v0 }
 0x23f   : > { %709 = vmatmul.mubr.msk.bf16.vlgmr.msra.gmra.mrb[8].mxu1 %vm124_vm1, %v351_v29 }
 0x240   : > { %719 = vmatpush3.bf16.xpose.msra.mxu1 %v470_v32  ;;  %720 = vmatprep.mubr.msk.bf16.mxu1 %vm772_vm0, %v771_v0 }
 0x247   : > { %721 = vmatmul.mubr.msk.bf16.vlgmr.msra.gmra.mrb[12].mxu1 %vm124_vm1, %v463_v33 }
 0x302   : > { %v848_v34 = vpop.f32.mrb[0].mxu1 }
 0x303   : > { %v692_v35 = vpop.f32.mrb[1].mxu1 }
 0x304   : > { %v230_v36 = vpop.f32.mrb[2].mxu1 }
 0x305   : > { %v693_v37 = vpop.f32.mrb[3].mxu1 }
 0x30a   : > { %v279_v38 = vpop.f32.mrb[4].mxu1 }
 0x30b   : > { %v285_v39 = vmul.f32 0.17677669, %v279_v38  ;;  %v698_v40 = vpop.f32.mrb[5].mxu1 }
 0x30c   : > { %v282_v41 = vpop.f32.mrb[6].mxu1 }
 0x30d   : > { %v699_v42 = vpop.f32.mrb[7].mxu1  ;;  %v286_v43 = vsel %vm120_vm2, %v285_v39, -1e+30 }
 0x30e   : > { %v287_v44 = vsel %vm173_vm3, %v286_v43, -inf }
 0x30f   : > { %288 = vmax.xlane.f32.xlu1 %v287_v44 }
 0x312   : > { %v394_v45 = vpop.f32.mrb[8].mxu1 }
 0x313   : > { %v400_v46 = vmul.f32 0.17677669, %v394_v45  ;;  %v710_v47 = vpop.f32.mrb[9].mxu1 }
 0x314   : > { %v397_v48 = vpop.f32.mrb[10].mxu1 }
 0x315   : > { %v401_v49 = vsel %vm120_vm2, %v400_v46, -1e+30  ;;  %v711_v50 = vpop.f32.mrb[11].mxu1 }
 0x316   : > { %v402_v51 = vsel %vm173_vm3, %v401_v49, -inf }
 0x317   : > { %403 = vmax.xlane.f32.xlu0 %v402_v51 }
 0x31a   : > { %v506_v52 = vpop.f32.mrb[12].mxu1 }
 0x31b   : > { %v512_v53 = vmul.f32 0.17677669, %v506_v52  ;;  %v722_v54 = vpop.f32.mrb[13].mxu1 }
 0x31c   : > { %v509_v55 = vpop.f32.mrb[14].mxu1 }
 0x31d   : > { %v513_v56 = vsel %vm120_vm2, %v512_v53, -1e+30  ;;  %v723_v57 = vpop.f32.mrb[15].mxu1 }
 0x31e   : > { %v514_v58 = vsel %vm173_vm3, %v513_v56, -inf }
 0x31f   : > { %515 = vmax.xlane.f32.xlu1 %v514_v58 }
 0x39c   : > { %v289_v59 = vpop.xlane.xlu1 %288 }
 0x39d   : > { %v290_v60 = vsub.f32 %v286_v43, %v289_v59 }
 0x39f   : > { %v291_v61 = vmul.f32 1.442695, %v290_v60 }
 0x3a1   : > { %751 = vpow2.f32 %v291_v61 }
 0x3a4   : > { %v404_v62 = vpop.xlane.xlu0 %403 }
 0x3a5   : > { %v405_v63 = vsub.f32 %v401_v49, %v404_v62 }
 0x3a7   : > { %v406_v1 = vmul.f32 1.442695, %v405_v63 }
 0x3a9   : > { %753 = vpow2.f32 %v406_v1 }
 0x3ab   : > { %v752_v2 = vpop.eup %751 }
 0x3ac   : > { %v293_v3 = vsel %vm173_vm3, %v752_v2, 0.0  ;;  %v516_v7 = vpop.xlane.xlu1 %515 }
 0x3ad   : > { %294 = vadd.xlane.f32.xlu1 %v293_v3  ;;  %v517_v8 = vsub.f32 %v513_v56, %v516_v7 }
 0x3af   : > { %v518_v9 = vmul.f32 1.442695, %v517_v8 }
 0x3b1   : > { %755 = vpow2.f32 %v518_v9 }
 0x3b3   : > { %v754_v4 = vpop.eup %753 }
 0x3b4   : > { %v408_v5 = vsel %vm173_vm3, %v754_v4, 0.0 }
 0x3b5   : > { %409 = vadd.xlane.f32.xlu0 %v408_v5 }
 0x3bb   : > { %v756_v10 = vpop.eup %755 }
 0x3bc   : > { %v520_v11 = vsel %vm173_vm3, %v756_v10, 0.0 }
 0x3be   : > { %414 = vrot.lane.b32.xlu1 %v658_v6, %s774_s13 }
 0x3cb   : > { %302 = vrot.lane.b32.xlu0 %v658_v6, %s773_s12 }
 0x3e2   : > { %521 = vadd.xlane.f32.xlu1 %v520_v11 }
 0x3f3   : > { %526 = vrot.lane.b32.xlu1 %v658_v6, %s775_s14 }
 0x43a   : > { %v295_v12 = vpop.xlane.xlu1 %294 }
 0x43b   : > { %757 = vrcp.f32 %v295_v12 }
 0x43e   : > { %v415_v18 = vpop.permute.xlu1 %414 }
 0x43f   : > { %v420_v20 = vsel %vm189_vm4, %v415_v18, 0 }
 0x442   : > { %v410_v13 = vpop.xlane.xlu0 %409 }
 0x443   : > { %759 = vrcp.f32 %v410_v13 }
 0x445   : > { %v758_v14 = vpop.eup %757 }
 0x446   : > { %v297_v15 = vmul.f32 %v758_v14, %v752_v2  ;;  %v303_v16 = vpop.permute.xlu0 %302 }
 0x447   : > { %v308_v17 = vsel %vm189_vm4, %v303_v16, 0 }
 0x448   : > { %701 = vmatpush3.bf16.msra.mxu0 %v308_v17  ;;  %v298_v19 = vpack.c.bf16 %v297_v15, %v297_v15 }
 0x449   : > { %712 = vmatprep.subr.bf16.mxu0 %v771_v0 }
 0x44b   : > { %703 = vmatmul.mubr.msk.bf16.vlgmr.msra.gmra.mrb[4].mxu0 %vm173_vm3, %v298_v19 }
 0x44c   : > { %713 = vmatpush3.bf16.msra.mxu0 %v420_v20  ;;  %714 = vmatprep.mubr.msk.bf16.mxu0 %vm772_vm0, %v771_v0 }
 0x44d   : > { %v760_v21 = vpop.eup %759  ;;  %724 = vmatprep.subr.bf16.mxu0 %v771_v0 }
 0x44e   : > { %v412_v22 = vmul.f32 %v760_v21, %v754_v4 }
 0x450   : > { %v413_v23 = vpack.c.bf16 %v412_v22, %v412_v22 }
 0x453   : > { %715 = vmatmul.mubr.msk.bf16.vlgmr.msra.gmra.mrb[8].mxu0 %vm173_vm3, %v413_v23 }
 0x454   : > { %726 = vmatprep.mubr.msk.bf16.mxu0 %vm772_vm0, %v771_v0 }
 0x46f   : > { %v522_v24 = vpop.xlane.xlu1 %521 }
 0x470   : > { %761 = vrcp.f32 %v522_v24 }
 0x473   : > { %v527_v25 = vpop.permute.xlu1 %526 }
 0x474   : > { %v532_v26 = vsel %vm189_vm4, %v527_v25, 0 }
 0x475   : > { %725 = vmatpush3.bf16.msra.mxu0 %v532_v26 }
 0x47a   : > { %v762_v27 = vpop.eup %761 }
 0x47b   : > { %v524_v28 = vmul.f32 %v762_v27, %v756_v10 }
 0x47d   : > { %v525_v29 = vpack.c.bf16 %v524_v28, %v524_v28 }
 0x47f   : > { %727 = vmatmul.mubr.msk.bf16.vlgmr.msra.gmra.mrb[12].mxu0 %vm173_vm3, %v525_v29 }
 0x51e   : > { %v344_v30 = vpop.f32.mrb[4].mxu0 }
 0x51f   : > { %575 = vrot.lane.b32.xlu0 %v344_v30, %s775_s14  ;;  %v704_v31 = vpop.f32.mrb[5].mxu0 }
 0x520   : > { %v347_v32 = vpop.f32.mrb[6].mxu0 }
 0x521   : > { %v705_v33 = vpop.f32.mrb[7].mxu0 }
 0x526   : > { %v456_v35 = vpop.f32.mrb[8].mxu0 }
 0x527   : > { %579 = vrot.lane.b32.xlu1 %v456_v35, %s774_s13  ;;  %v716_v0 = vpop.f32.mrb[9].mxu0 }
 0x528   : > { %v459_v36 = vpop.f32.mrb[10].mxu0 }
 0x529   : > { %v717_v37 = vpop.f32.mrb[11].mxu0 }
 0x552   : > { %v568_v38 = vpop.f32.mrb[12].mxu0 }
 0x553   : > { %583 = vrot.lane.b32.xlu0 %v568_v38, %s773_s12  ;;  %v728_v39 = vpop.f32.mrb[13].mxu0 }
 0x554   : > { %v571_v40 = vpop.f32.mrb[14].mxu0 }
 0x555   : > { %v729_v41 = vpop.f32.mrb[15].mxu0 }
 0x591   : > { %v576_v42 = vpop.permute.xlu0 %575 }
 0x592   : > { %v586_v44 = vsel %vm124_vm1, %v848_v34, %v576_v42 }
 0x599   : > { %v580_v43 = vpop.permute.xlu1 %579 }
 0x59a   : > { %v588_v45 = vsel %vm587_vm5, %v586_v44, %v580_v43 }
 0x5c5   : > { %v584_v46 = vpop.permute.xlu0 %583 }
 0x5c6   : > { %v590_v47 = vsel %vm589_vm6, %v588_v45, %v584_v46 }
 0x5c7   : > { %v591_v48 = vpack.c.bf16 %v590_v47, %v590_v47 }
 0x5c9   : > { %592 = vst [vmem:[%s114_s18] sm:$0xf] %v591_v48 }
 0x5ca PF: > { %s11_s6 = sadd.s32 1, %s769_s6  }
 0x5cb   : > { %p8_p4 = scmp.ge.s32.totalorder %s11_s6, 4  }
 0x5cd   :  { %10 = sbr.rel (!%p8_p4) target bundleno = 1 (0x1), region = 54 }

// kernel: blip_cir_visual_forward.20
= control target key start
LH: loop header
LB: loop body
LE: loop exit
PB: predicated region body
PF: predicated region fallthrough
CT: control target
= control target key end

     0   :  { %vm22_vm0 = vcmask 1041408   ;;  %v278_v18 = vmov 0   ;;  %v72_v34 = vlaneseq  ;;  %s376_s0 = inlined_call_operand.vmem [shape: f32[2,128], index: 0, kind: input, shape index: {}]   ;;  %s377_s3 = inlined_call_operand.vmem [shape: bf16[128,256], index: 3, kind: input, shape index: {}]   ;;  %s378_s1 = inlined_call_operand.vmem [shape: f32[1,128], index: 1, kind: input, shape index: {}]   ;;  %s379_s2 = inlined_call_operand.vmem [shape: f32[1,128], index: 2, kind: input, shape index: {}]   ;;  %s380_s4 = inlined_call_operand.vmem [shape: f32[1,256], index: 4, kind: input, shape index: {}]   ;;  %s381_s5 = inlined_call_operand.vmem [shape: f32[2,256], index: 5, kind: output, shape index: {}]  }
   0x1   :  { %v21_v0 = vld [vmem:[%s376_s0] sm:$0x3]  ;;  %v250_v2 = vld [vmem:[%s377_s3 + $0x4] ss:$8 sps:$4 sm:$0xff]   ;;  %v253_v4 = vld [vmem:[%s377_s3 + $0x14] ss:$8 sps:$4 sm:$0xff]   ;;  %194 = vmatprep.mubr.bf16.mxu0 %v278_v18 }
   0x2   :  { %v23_v1 = vsel %vm22_vm0, %v21_v0, 0.0  ;;  %v252_v3 = vld [vmem:[%s377_s3] ss:$8 sps:$4 sm:$0xff]   ;;  %162 = vmatprep.subr.bf16.mxu0 %v250_v2  ;;  %v255_v5 = vld [vmem:[%s377_s3 + $0x10] ss:$8 sps:$4 sm:$0xff]   ;;  %v73_v35 = vshrl.u32 %v72_v34, 7 }
   0x3   :  { %24 = vadd.xlane.f32.xlu0 %v23_v1  ;;  %163 = vmatpush1.bf16.msra.mxu0 %v252_v3  ;;  %v256_v6 = vld [vmem:[%s377_s3 + $0x24] ss:$8 sps:$4 sm:$0xff]   ;;  %v258_v12 = vld [vmem:[%s377_s3 + $0x20] ss:$8 sps:$4 sm:$0xff]   ;;  %v259_v13 = vld [vmem:[%s377_s3 + $0x34] ss:$8 sps:$4 sm:$0xff]  }
   0x4   :  { %164 = vmatprep.subr.bf16.mxu0 %v253_v4  ;;  %v261_v14 = vld [vmem:[%s377_s3 + $0x30] ss:$8 sps:$4 sm:$0xff]   ;;  %v262_v15 = vld [vmem:[%s377_s3 + $0x44] ss:$8 sps:$4 sm:$0xff]   ;;  %v264_v16 = vld [vmem:[%s377_s3 + $0x40] ss:$8 sps:$4 sm:$0xff]  }
   0x5   :  { %v265_v17 = vld [vmem:[%s377_s3 + $0x54] ss:$8 sps:$4 sm:$0xff]   ;;  %v267_v19 = vld [vmem:[%s377_s3 + $0x50] ss:$8 sps:$4 sm:$0xff]   ;;  %v268_v20 = vld [vmem:[%s377_s3 + $0x64] ss:$8 sps:$4 sm:$0xff]  }
   0x6   :  { %v270_v21 = vld [vmem:[%s377_s3 + $0x60] ss:$8 sps:$4 sm:$0xff]   ;;  %v271_v22 = vld [vmem:[%s377_s3 + $0x74] ss:$8 sps:$4 sm:$0xff]   ;;  %v273_v23 = vld [vmem:[%s377_s3 + $0x70] ss:$8 sps:$4 sm:$0xff]  }
   0x7   :  { %165 = vmatpush1.bf16.msra.mxu0 %v255_v5  ;;  %v230_v28 = vld [vmem:[%s378_s1] ss:$0 sm:$0xff]  ;;  %v74_v36 = vsub.s32 0, %v73_v35  ;;  %v78_v38 = vsub.s32 1, %v73_v35 }
   0x8   :  { %166 = vmatprep.subr.bf16.mxu0 %v256_v6  ;;  %v231_v30 = vld [vmem:[%s379_s2] ss:$0 sm:$0xff] }
   0x9   :  { %v70_v37 = vld [vmem:[%s380_s4] sm:$0x3] }
   0xa   :  { %v75_v39 = vrot.slane %v70_v37, %v74_v36  ;;  %v79_v40 = vrot.slane %v70_v37, %v78_v38 }
   0xb   :  { %167 = vmatpush1.bf16.msra.mxu0 %v258_v12 }
   0xc   :  { %168 = vmatprep.subr.bf16.mxu0 %v259_v13 }
   0xf   :  { %169 = vmatpush1.bf16.msra.mxu0 %v261_v14 }
  0x10   :  { %170 = vmatprep.subr.bf16.mxu0 %v262_v15 }
  0x13   :  { %171 = vmatpush1.bf16.msra.mxu0 %v264_v16 }
  0x14   :  { %172 = vmatprep.subr.bf16.mxu0 %v265_v17 }
  0x17   :  { %173 = vmatpush1.bf16.msra.mxu0 %v267_v19 }
  0x18   :  { %174 = vmatprep.subr.bf16.mxu0 %v268_v20 }
  0x1b   :  { %175 = vmatpush1.bf16.msra.mxu0 %v270_v21 }
  0x1c   :  { %176 = vmatprep.subr.bf16.mxu0 %v271_v22 }
  0x1f   :  { %177 = vmatpush1.bf16.msra.mxu0 %v273_v23 }
  0x90   :  { %v25_v7 = vpop.xlane.xlu0 %24 }
  0x91   :  { %v27_v8 = vmul.f32 0.0078125, %v25_v7 }
  0x93   :  { %v28_v9 = vsub.f32 %v21_v0, %v27_v8 }
  0x95   :  { %v29_v10 = vmul.f32 %v28_v9, %v28_v9 }
  0x97   :  { %v30_v11 = vsel %vm22_vm0, %v29_v10, 0.0 }
  0x98   :  { %31 = vadd.xlane.f32.xlu0 %v30_v11 }
 0x125   :  { %v32_v24 = vpop.xlane.xlu0 %31 }
 0x126   :  { %v33_v25 = vmul.f32 0.0078125, %v32_v24 }
 0x128   :  { %v34_v26 = vadd.f32 1e-06, %v33_v25 }
 0x12a   :  { %274 = vrsqrt.f32 %v34_v26 }
 0x134   :  { %v275_v27 = vpop.eup %274 }
 0x135   :  { %v36_v29 = vmul.f32 %v275_v27, %v28_v9 }
 0x137   :  { %v44_v31 = vmul.f32 %v230_v28, %v36_v29 }
 0x139   :  { %v52_v32 = vadd.f32 %v231_v30, %v44_v31 }
 0x13b   :  { %v53_v33 = vpack.c.bf16 %v52_v32, %v52_v32 }
 0x13d   :  { %195 = vmatmul.mubr.bf16.vlgmr.msra.gmra.mrb[0].mxu0 %v53_v33 }
 0x210   :  { %v196_v41 = vpop.f32.mrb[0].mxu0 }
 0x211   :  { %v197_v42 = vadd.f32 %v196_v41, %v75_v39  ;;  %v198_v43 = vpop.f32.mrb[1].mxu0 }
 0x212   :  { %v199_v44 = vadd.f32 %v198_v43, %v79_v40  ;;  %v200_v45 = vpop.f32.mrb[2].mxu0 }
 0x213   :  { %v203_v46 = vmul.f32 %v197_v42, %v197_v42  ;;  %v201_v47 = vpop.f32.mrb[3].mxu0 }
 0x214   :  { %v204_v48 = vmul.f32 %v199_v44, %v199_v44 }
 0x215   :  { %v205_v49 = vsel %vm22_vm0, %v203_v46, 0.0 }
 0x216   :  { %v206_v50 = vsel %vm22_vm0, %v204_v48, 0.0 }
 0x217   :  { %v207_v51 = vadd.f32 %v206_v50, %v205_v49 }
 0x219   :  { %208 = vadd.xlane.f32.xlu1 %v207_v51 }
 0x2a6   :  { %v209_v52 = vpop.xlane.xlu1 %208 }
 0x2a7   :  { %v210_v53 = vmax.f32 %v209_v52, 1e-24 }
 0x2a9   :  { %276 = vrsqrt.f32 %v210_v53 }
 0x2b3   :  { %v277_v54 = vpop.eup %276 }
 0x2b4   :  { %v212_v55 = vmul.f32 %v277_v54, %v197_v42  ;;  %v213_v56 = vmul.f32 %v277_v54, %v199_v44 }
 0x2b6   :  { %v216_v57 = vcombine.low %v212_v55, %v213_v56 }
 0x2b8   :  { %248 = vst.sshfl [vmem:[%s381_s5] sm:$0x33 pattern:$0x76325410] %v216_v57 }

// kernel: blip_cir_visual_forward.15
= control target key start
LH: loop header
LB: loop body
LE: loop exit
PB: predicated region body
PF: predicated region fallthrough
CT: control target
= control target key end

     0   :  { %v577_v21 = vmov 0   ;;  %v97_v60 = vlaneseq  ;;  %s748_s0 = inlined_call_operand.vmem [shape: f32[16,128], index: 0, kind: input, shape index: {}]   ;;  %s749_s3 = inlined_call_operand.vmem [shape: bf16[128,256], index: 3, kind: input, shape index: {}]   ;;  %s750_s1 = inlined_call_operand.vmem [shape: f32[1,128], index: 1, kind: input, shape index: {}]   ;;  %s751_s2 = inlined_call_operand.vmem [shape: f32[1,128], index: 2, kind: input, shape index: {}]   ;;  %s752_s5 = inlined_call_operand.vmem [shape: bf16[256,128], index: 5, kind: input, shape index: {}]   ;;  %s753_s4 = inlined_call_operand.vmem [shape: f32[1,256], index: 4, kind: input, shape index: {}]   ;;  %s754_s6 = inlined_call_operand.vmem [shape: f32[1,128], index: 6, kind: input, shape index: {}]   ;;  %s755_s7 = inlined_call_operand.vmem [shape: f32[16,128], index: 7, kind: output, shape index: {}]  }
   0x1   :  { %v621_v0 = vld [vmem:[%s748_s0] sm:$0xff]  ;;  %v627_v1 = vld [vmem:[%s748_s0 + $0x8] sm:$0xff]  ;;  %v528_v4 = vld [vmem:[%s749_s3 + $0x14] ss:$8 sps:$4 sm:$0xff]   ;;  %219 = vmatprep.mubr.bf16.mxu0 %v577_v21 }
   0x2   :  { %33 = vadd.xlane.f32.xlu0 %v621_v0  ;;  %v525_v2 = vld [vmem:[%s749_s3 + $0x4] ss:$8 sps:$4 sm:$0xff]   ;;  %v527_v3 = vld [vmem:[%s749_s3] ss:$8 sps:$4 sm:$0xff]   ;;  %v530_v13 = vld [vmem:[%s749_s3 + $0x10] ss:$8 sps:$4 sm:$0xff]  }
   0x3   :  { %187 = vmatprep.subr.bf16.mxu0 %v525_v2  ;;  %v531_v14 = vld [vmem:[%s749_s3 + $0x24] ss:$8 sps:$4 sm:$0xff]   ;;  %v533_v15 = vld [vmem:[%s749_s3 + $0x20] ss:$8 sps:$4 sm:$0xff]   ;;  %v534_v16 = vld [vmem:[%s749_s3 + $0x34] ss:$8 sps:$4 sm:$0xff]  }
   0x4   :  { %188 = vmatpush1.bf16.msra.mxu0 %v527_v3  ;;  %v536_v17 = vld [vmem:[%s749_s3 + $0x30] ss:$8 sps:$4 sm:$0xff]   ;;  %v537_v18 = vld [vmem:[%s749_s3 + $0x44] ss:$8 sps:$4 sm:$0xff]   ;;  %v539_v19 = vld [vmem:[%s749_s3 + $0x40] ss:$8 sps:$4 sm:$0xff]  }
   0x5   :  { %189 = vmatprep.subr.bf16.mxu0 %v528_v4  ;;  %v540_v20 = vld [vmem:[%s749_s3 + $0x54] ss:$8 sps:$4 sm:$0xff]   ;;  %v542_v22 = vld [vmem:[%s749_s3 + $0x50] ss:$8 sps:$4 sm:$0xff]   ;;  %v543_v23 = vld [vmem:[%s749_s3 + $0x64] ss:$8 sps:$4 sm:$0xff]  }
   0x6   :  { %35 = vadd.xlane.f32.xlu0 %v627_v1  ;;  %v545_v24 = vld [vmem:[%s749_s3 + $0x60] ss:$8 sps:$4 sm:$0xff]   ;;  %v546_v25 = vld [vmem:[%s749_s3 + $0x74] ss:$8 sps:$4 sm:$0xff]   ;;  %v548_v26 = vld [vmem:[%s749_s3 + $0x70] ss:$8 sps:$4 sm:$0xff]  }
   0x7   :  { %v467_v35 = vld [vmem:[%s750_s1] ss:$0 sm:$0xff]  ;;  %v551_v46 = vld [vmem:[%s752_s5 + $0x48] sm:$0xff]   ;;  %v553_v48 = vld [vmem:[%s752_s5 + $0x50] sm:$0xff]   ;;  %v98_v61 = vshrl.u32 %v97_v60, 7 }
   0x8   :  { %190 = vmatpush1.bf16.msra.mxu0 %v530_v13  ;;  %v468_v39 = vld [vmem:[%s751_s2] ss:$0 sm:$0xff]  ;;  %v552_v47 = vld [vmem:[%s752_s5 + $0x8] sm:$0xff]   ;;  %v554_v49 = vld [vmem:[%s752_s5 + $0x10] sm:$0xff]  }
   0x9   :  { %191 = vmatprep.subr.bf16.mxu0 %v531_v14  ;;  %v549_v44 = vld [vmem:[%s752_s5 + $0x40] sm:$0xff]   ;;  %v555_v50 = vld [vmem:[%s752_s5 + $0x58] sm:$0xff]   ;;  %v559_v54 = vld [vmem:[%s752_s5 + $0x68] sm:$0xff]   ;;  %v99_v62 = vsub.s32 0, %v98_v61  ;;  %v103_v2 = vsub.s32 1, %v98_v61 }
   0xa   :  { %v550_v45 = vld [vmem:[%s752_s5] sm:$0xff]   ;;  %502 = vmatprep.subr.bf16.mxu1 %v549_v44  ;;  %v556_v51 = vld [vmem:[%s752_s5 + $0x18] sm:$0xff]   ;;  %v560_v55 = vld [vmem:[%s752_s5 + $0x28] sm:$0xff]  }
   0xb   :  { %503 = vmatpush3.bf16.msra.mxu1 %v550_v45  ;;  %v557_v52 = vld [vmem:[%s752_s5 + $0x60] sm:$0xff]   ;;  %v561_v56 = vld [vmem:[%s752_s5 + $0x70] sm:$0xff]   ;;  %v563_v58 = vld [vmem:[%s752_s5 + $0x78] sm:$0xff]  }
   0xc   :  { %192 = vmatpush1.bf16.msra.mxu0 %v533_v15  ;;  %504 = vmatprep.subr.bf16.mxu1 %v551_v46  ;;  %v558_v53 = vld [vmem:[%s752_s5 + $0x20] sm:$0xff]   ;;  %v562_v57 = vld [vmem:[%s752_s5 + $0x30] sm:$0xff]   ;;  %v564_v59 = vld [vmem:[%s752_s5 + $0x38] sm:$0xff]  }
   0xd   :  { %193 = vmatprep.subr.bf16.mxu0 %v534_v16  ;;  %v95_v63 = vld [vmem:[%s753_s4] sm:$0x3] }
   0xe   :  { %v100_v3 = vrot.slane %v95_v63, %v99_v62  ;;  %v104_v4 = vrot.slane %v95_v63, %v103_v2 }
   0xf   :  { %505 = vmatpush3.bf16.msra.mxu1 %v552_v47 }
  0x10   :  { %194 = vmatpush1.bf16.msra.mxu0 %v536_v17  ;;  %506 = vmatprep.subr.bf16.mxu1 %v553_v48 }
  0x11   :  { %195 = vmatprep.subr.bf16.mxu0 %v537_v18 }
  0x13   :  { %507 = vmatpush3.bf16.msra.mxu1 %v554_v49 }
  0x14   :  { %196 = vmatpush1.bf16.msra.mxu0 %v539_v19  ;;  %508 = vmatprep.subr.bf16.mxu1 %v555_v50 }
  0x15   :  { %197 = vmatprep.subr.bf16.mxu0 %v540_v20 }
  0x17   :  { %509 = vmatpush3.bf16.msra.mxu1 %v556_v51 }
  0x18   :  { %198 = vmatpush1.bf16.msra.mxu0 %v542_v22  ;;  %510 = vmatprep.subr.bf16.mxu1 %v557_v52 }
  0x19   :  { %199 = vmatprep.subr.bf16.mxu0 %v543_v23 }
  0x1b   :  { %511 = vmatpush3.bf16.msra.mxu1 %v558_v53 }
  0x1c   :  { %200 = vmatpush1.bf16.msra.mxu0 %v545_v24  ;;  %512 = vmatprep.subr.bf16.mxu1 %v559_v54 }
  0x1d   :  { %201 = vmatprep.subr.bf16.mxu0 %v546_v25 }
  0x1f   :  { %513 = vmatpush3.bf16.msra.mxu1 %v560_v55  ;;  %v501_v55 = vld [vmem:[%s754_s6] ss:$0 sm:$0xff] }
  0x20   :  { %202 = vmatpush1.bf16.msra.mxu0 %v548_v26  ;;  %514 = vmatprep.subr.bf16.mxu1 %v561_v56 }
  0x23   :  { %515 = vmatpush3.bf16.msra.mxu1 %v562_v57 }
  0x24   :  { %516 = vmatprep.subr.bf16.mxu1 %v563_v58 }
  0x27   :  { %517 = vmatpush3.bf16.msra.mxu1 %v564_v59 }
  0x8f   :  { %v34_v5 = vpop.xlane.xlu0 %33 }
  0x90   :  { %v38_v6 = vmul.f32 0.0078125, %v34_v5 }
  0x92   :  { %v40_v7 = vsub.f32 %v621_v0, %v38_v6 }
  0x93   :  { %v36_v8 = vpop.xlane.xlu0 %35 }
  0x94   :  { %v39_v9 = vmul.f32 0.0078125, %v36_v8  ;;  %v42_v10 = vmul.f32 %v40_v7, %v40_v7 }
  0x96   :  { %v41_v11 = vsub.f32 %v627_v1, %v39_v9  ;;  %44 = vadd.xlane.f32.xlu1 %v42_v10 }
  0x98   :  { %v43_v12 = vmul.f32 %v41_v11, %v41_v11 }
  0x9a   :  { %46 = vadd.xlane.f32.xlu1 %v43_v12 }
 0x123   :  { %v45_v27 = vpop.xlane.xlu1 %44 }
 0x124   :  { %v48_v28 = vmul.f32 0.0078125, %v45_v27 }
 0x126   :  { %v50_v29 = vadd.f32 1e-06, %v48_v28 }
 0x127   :  { %v47_v30 = vpop.xlane.xlu1 %46 }
 0x128   :  { %565 = vrsqrt.f32 %v50_v29  ;;  %v49_v31 = vmul.f32 0.0078125, %v47_v30 }
 0x12a   :  { %v51_v32 = vadd.f32 1e-06, %v49_v31 }
 0x12c   :  { %567 = vrsqrt.f32 %v51_v32 }
 0x132   :  { %v566_v33 = vpop.eup %565 }
 0x133   :  { %v54_v34 = vmul.f32 %v566_v33, %v40_v7 }
 0x135   :  { %v63_v38 = vmul.f32 %v467_v35, %v54_v34 }
 0x136   :  { %v568_v36 = vpop.eup %567 }
 0x137   :  { %v55_v37 = vmul.f32 %v568_v36, %v41_v11  ;;  %v72_v41 = vadd.f32 %v468_v39, %v63_v38 }
 0x139   :  { %v64_v40 = vmul.f32 %v467_v35, %v55_v37 }
 0x13b   :  { %v73_v42 = vadd.f32 %v468_v39, %v64_v40 }
 0x13d   :  { %v74_v43 = vpack.c.bf16 %v73_v42, %v72_v41 }
 0x13f   :  { %220 = vmatmul.mubr.bf16.vlgmr.msra.gmra.mrb[0].mxu0 %v74_v43 }
 0x212   :  { %v221_v5 = vpop.f32.mrb[0].mxu0 }
 0x213   :  { %v222_v6 = vadd.f32 %v221_v5, %v100_v3  ;;  %v223_v7 = vpop.f32.mrb[1].mxu0 }
 0x214   :  { %v224_v8 = vadd.f32 %v223_v7, %v104_v4  ;;  %v225_v9 = vpop.f32.mrb[2].mxu0 }
 0x215   :  { %v230_v10 = vmul.f32 %v222_v6, %v222_v6  ;;  %v226_v11 = vadd.f32 %v225_v9, %v100_v3  ;;  %v227_v12 = vpop.f32.mrb[3].mxu0 }
 0x216   :  { %v231_v13 = vmul.f32 %v224_v8, %v224_v8  ;;  %v228_v14 = vadd.f32 %v227_v12, %v104_v4 }
 0x217   :  { %v234_v15 = vmul.f32 %v230_v10, %v222_v6  ;;  %v232_v16 = vmul.f32 %v226_v11, %v226_v11 }
 0x218   :  { %v235_v17 = vmul.f32 %v231_v13, %v224_v8  ;;  %v233_v18 = vmul.f32 %v228_v14, %v228_v14 }
 0x219   :  { %v238_v19 = vmul.f32 0.044715, %v234_v15  ;;  %v236_v20 = vmul.f32 %v232_v16, %v226_v11 }
 0x21a   :  { %v239_v21 = vmul.f32 0.044715, %v235_v17  ;;  %v237_v22 = vmul.f32 %v233_v18, %v228_v14 }
 0x21b   :  { %v242_v23 = vadd.f32 %v238_v19, %v222_v6  ;;  %v240_v24 = vmul.f32 0.044715, %v236_v20 }
 0x21c   :  { %v241_v25 = vmul.f32 0.044715, %v237_v22  ;;  %v243_v26 = vadd.f32 %v239_v21, %v224_v8 }
 0x21d   :  { %v246_v27 = vmul.f32 0.7978846, %v242_v23  ;;  %v244_v28 = vadd.f32 %v240_v24, %v226_v11 }
 0x21e   :  { %v245_v29 = vadd.f32 %v241_v25, %v228_v14  ;;  %v247_v30 = vmul.f32 0.7978846, %v243_v26 }
 0x21f   :  { %569 = vtanh.f32 %v246_v27  ;;  %v248_v31 = vmul.f32 0.7978846, %v244_v28 }
 0x220   :  { %v249_v32 = vmul.f32 0.7978846, %v245_v29  ;;  %571 = vtanh.f32 %v247_v30 }
 0x221   :  { %573 = vtanh.f32 %v248_v31 }
 0x222   :  { %575 = vtanh.f32 %v249_v32 }
 0x229   :  { %v570_v33 = vpop.eup %569 }
 0x22a   :  { %v572_v34 = vpop.eup %571  ;;  %v254_v35 = vadd.f32 1.0, %v570_v33 }
 0x22b   :  { %v574_v36 = vpop.eup %573  ;;  %v255_v37 = vadd.f32 1.0, %v572_v34 }
 0x22c   :  { %v576_v38 = vpop.eup %575  ;;  %v256_v39 = vadd.f32 1.0, %v574_v36  ;;  %v258_v40 = vmul.f32 0.5, %v254_v35 }
 0x22d   :  { %v257_v41 = vadd.f32 1.0, %v576_v38  ;;  %v259_v42 = vmul.f32 0.5, %v255_v37 }
 0x22e   :  { %v260_v43 = vmul.f32 0.5, %v256_v39  ;;  %v262_v45 = vmul.f32 %v258_v40, %v222_v6 }
 0x22f   :  { %v261_v44 = vmul.f32 0.5, %v257_v41  ;;  %v263_v47 = vmul.f32 %v259_v42, %v224_v8 }
 0x230   :  { %v264_v46 = vmul.f32 %v260_v43, %v226_v11 }
 0x231   :  { %v265_v48 = vmul.f32 %v261_v44, %v228_v14 }
 0x232   :  { %v268_v49 = vpack.c.bf16 %v264_v46, %v262_v45 }
 0x233   :  { %v269_v50 = vpack.c.bf16 %v265_v48, %v263_v47 }
 0x235   :  { %430 = vmatprep.mubr.bf16.mxu1 %v269_v50 }
 0x236   :  { %431 = vmatmul.mubr.bf16.vlgmr.msra.gmra.mrb[0].mxu1 %v268_v49 }
 0x309   :  { %v518_v51 = vpop.f32.mrb[0].mxu1 }
 0x30a   :  { %v519_v52 = vpop.f32.mrb[1].mxu1 }
 0x30b   :  { %v520_v53 = vadd.f32 %v519_v52, %v518_v51  ;;  %v521_v54 = vpop.f32.mrb[2].mxu1 }
 0x30c   :  { %v522_v56 = vpop.f32.mrb[3].mxu1 }
 0x30d   :  { %v450_v57 = vadd.f32 %v520_v53, %v621_v0  ;;  %v523_v58 = vadd.f32 %v522_v56, %v521_v54 }
 0x30f   :  { %v459_v59 = vadd.f32 %v501_v55, %v450_v57  ;;  %v451_v60 = vadd.f32 %v523_v58, %v627_v1 }
 0x311   :  { %461 = vst [vmem:[%s755_s7] sm:$0xff] %v459_v59  ;;  %v460_v61 = vadd.f32 %v501_v55, %v451_v60 }
 0x313   :  { %462 = vst [vmem:[%s755_s7 + $0x8] sm:$0xff] %v460_v61 }

// kernel: blip_cir_visual_forward.21
= control target key start
LH: loop header
LB: loop body
LE: loop exit
PB: predicated region body
PF: predicated region fallthrough
CT: control target
= control target key end

     0   :  { %v19_v1 = vlaneseq  ;;  %v275_v2 = vmov 1983009808   ;;  %s320_s0 = inlined_call_operand.vmem [shape: f32[2,256], index: 0, kind: input, shape index: {}]   ;;  %s321_s1 = inlined_call_operand.vmem [shape: f32[2,256], index: 1, kind: input, shape index: {}]   ;;  %s322_s2 = inlined_call_operand.hbm [shape: f32[1,1], index: 2, kind: output, shape index: {}]  }
   0x1   :  { %v13_v0 = vld [vmem:[%s321_s1] sm:$0xf]  ;;  %v17_v3 = vunpack.c.l.s4 %v275_v2 }
   0x2   :  { %7 = vsyncpa [#allocation3], 0  ;;  %v296_v4 = vshrl.u32 %v19_v1, 7  ;;  %v14_v5 = vmul.f32 %v13_v0, %v13_v0  ;;  %vm26_vm0 = vcmask 1041408   ;;  %v276_v17 = vmov 269488144  }
   0x3   :  { %v18_v6 = vunpack.c.0.s8 %v17_v3  ;;  %v231_v13 = vld.sshfl [vmem:[%s320_s0] sm:$0x33 pattern:$0x76325410]  ;;  %v36_v18 = vunpack.c.l.s4 %v276_v17  ;;  %vm143_vm1 = vcmask 9216   ;;  %v140_v49 = vand.u32 127, %v19_v1 }
   0x4   :  { %v52_v14 = vcombine.high %v231_v13, %v231_v13  ;;  %vm197_vm3 = vcmask 8192   ;;  %vm185_vm4 = vcmask 1024   ;;  %s277_s18 = smov [#allocation2]   ;;  %vm215_vm5 = vcmask 0  }
   0x5   :  { %v21_v7 = vsub.s32 %v18_v6, %v296_v4  ;;  %v37_v19 = vunpack.c.0.s8 %v36_v18  ;;  %vm141_vm2 = vcmp.eq.s32.totalorder %v296_v4, %v140_v49  ;;  %s223_s19 = sshll.u32 %s277_s18, 4  ;;  %s224_s19 = int_to_ptr.vmem [resolvable:$true] %s223_s19 }
   0x6   :  { %130 = vmatprep.mubr.f32.mxu0 %v52_v14  ;;  %s251_s21 = scalar_lea.vmem %s224_s19, 16  ;;  %s255_s22 = scalar_lea.vmem %s224_s19, 32 }
   0x7   :  { %v22_v8 = vrot.slane %v14_v5, %v21_v7  ;;  %v40_v20 = vsub.s32 %v37_v19, %v296_v4  ;;  %p252_p0 = scmp.ne.s32.totalorder %s224_s19, %s251_s21  ;;  %p256_p1 = scmp.lt.s32.totalorder %s224_s19, %s224_s19 }
   0x8   :  { %p257_p2 = scmp.lt.s32.totalorder %s255_s22, %s251_s21 }
   0x9   :  { %v23_v9 = vcombine.high %v22_v8, %v22_v8  ;;  %v27_v10 = vsel %vm26_vm0, %v22_v8, 0.0 }
   0xa   :  { %p258_p3 = por %p257_p2, %p256_p1 }
   0xb   :  { %v28_v11 = vsel %vm26_vm0, %v23_v9, 0.0 }
   0xc   :  { %v29_v12 = vadd.f32 %v28_v11, %v27_v10  ;;  %p259_p4 = pnand %p258_p3, %p252_p0 }
   0xe   :  { %30 = vadd.xlane.f32.xlu0 %v29_v12 }
  0x9b   :  { %v31_v15 = vpop.xlane.xlu0 %30 }
  0x9c   :  { %v32_v16 = vmax.f32 %v31_v15, 1e-24 }
  0x9e   :  { %241 = vrsqrt.f32 %v32_v16 }
  0xa8   :  { %v242_v21 = vpop.eup %241 }
  0xa9   :  { %v41_v22 = vrot.slane %v242_v21, %v40_v20 }
  0xab   :  { %v43_v23 = vmul.f32 %v41_v22, %v13_v0 }
  0xad   :  { %v62_v24 = vrot.slane %v43_v23, %v21_v7 }
  0xaf   :  { %v63_v25 = vcombine.high %v62_v24, %v62_v24 }
  0xb1   :  { %66 = vmatprep.subr.mxu0 %v63_v25 }
  0xb2   :  { %67 = vmatpush1.xpose.msra.mxu0 %v62_v24 }
  0xb5   :  { %131 = vmatmul.mubr.f32.vlgmr.msra.gmra.mrb[0].mxu0 %v231_v13 }
 0x188   :  { %v132_v26 = vpop.f32.mrb[0].mxu0 }
 0x189   :  { %v136_v27 = vmul.f32 14.285714, %v132_v26  ;;  %v134_v28 = vpop.f32.mrb[1].mxu0 }
 0x18b   :  { %v154_v29 = vsel %vm143_vm1, %v136_v27, -inf  ;;  %v142_v54 = vsel %vm141_vm2, %v136_v27, 0.0 }
 0x18c   :  { %155 = vmax.xlane.f32.xlu0 %v154_v29  ;;  %v166_v30 = vrot.slane %v154_v29, 4  ;;  %v144_v55 = vsel %vm143_vm1, %v142_v54, 0.0 }
 0x18e   :  { %v167_v31 = vmax.f32 %v154_v29, %v166_v30 }
 0x190   :  { %v168_v32 = vrot.slane %v167_v31, 2 }
 0x192   :  { %v169_v33 = vmax.f32 %v167_v31, %v168_v32 }
 0x194   :  { %v170_v34 = vrot.slane %v169_v33, 1 }
 0x196   :  { %v171_v35 = vmax.f32 %v169_v33, %v170_v34 }
 0x198   :  { %v172_v36 = vsub.f32 %v136_v27, %v171_v35 }
 0x19a   :  { %v173_v37 = vmul.f32 1.442695, %v172_v36 }
 0x19c   :  { %243 = vpow2.f32 %v173_v37 }
 0x1a6   :  { %v244_v38 = vpop.eup %243 }
 0x1a7   :  { %v175_v39 = vsel %vm143_vm1, %v244_v38, 0.0 }
 0x1a8   :  { %v176_v40 = vrot.slane %v175_v39, 4 }
 0x1aa   :  { %v177_v41 = vadd.f32 %v176_v40, %v175_v39 }
 0x1ac   :  { %v178_v42 = vrot.slane %v177_v41, 2 }
 0x1ae   :  { %v179_v43 = vadd.f32 %v178_v42, %v177_v41 }
 0x1b0   :  { %v180_v44 = vrot.slane %v179_v43, 1 }
 0x1b2   :  { %v181_v45 = vadd.f32 %v180_v44, %v179_v43 }
 0x1b4   :  { %245 = vlog2.f32 %v181_v45 }
 0x1be   :  { %v246_v50 = vpop.eup %245 }
 0x1bf   :  { %v183_v53 = vmul.f32 0.6931472, %v246_v50 }
 0x1c1   :  { %v184_v56 = vadd.f32 %v183_v53, %v171_v35 }
 0x1c3   :  { %v198_v57 = vsel %vm197_vm3, %v184_v56, 0.0 }
 0x219   :  { %v156_v46 = vpop.xlane.xlu0 %155 }
 0x21a   :  { %v157_v47 = vsub.f32 %v136_v27, %v156_v46 }
 0x21c   :  { %v158_v48 = vmul.f32 1.442695, %v157_v47 }
 0x21e   :  { %247 = vpow2.f32 %v158_v48 }
 0x228   :  { %v248_v51 = vpop.eup %247 }
 0x229   :  { %v160_v52 = vsel %vm143_vm1, %v248_v51, 0.0 }
 0x22a   :  { %161 = vadd.xlane.f32.xlu1 %v160_v52 }
 0x22e   :  { %145 = vadd.xlane.f32.xlu1 %v144_v55 }
 0x232   :  { %199 = vadd.xlane.f32.xlu1 %v198_v57 }
 0x2b7   :  { %v162_v58 = vpop.xlane.xlu1 %161 }
 0x2b8   :  { %249 = vlog2.f32 %v162_v58 }
 0x2bb   :  { %v146_v59 = vpop.xlane.xlu1 %145 }
 0x2bc   :  { %v147_v60 = vrot.slane %v146_v59, 4 }
 0x2be   :  { %v148_v61 = vadd.f32 %v147_v60, %v146_v59 }
 0x2bf   :  { %v200_v6 = vpop.xlane.xlu1 %199 }
 0x2c0   :  { %v149_v62 = vrot.slane %v148_v61, 2  ;;  %v201_v7 = vrot.slane %v200_v6, 4 }
 0x2c2   :  { %v250_v63 = vpop.eup %249  ;;  %v150_v0 = vadd.f32 %v149_v62, %v148_v61  ;;  %v202_v8 = vadd.f32 %v201_v7, %v200_v6 }
 0x2c3   :  { %v164_v1 = vmul.f32 0.6931472, %v250_v63 }
 0x2c4   :  { %v151_v2 = vrot.slane %v150_v0, 1  ;;  %v203_v9 = vrot.slane %v202_v8, 2 }
 0x2c5   :  { %v165_v3 = vadd.f32 %v164_v1, %v156_v46 }
 0x2c6   :  { %v152_v4 = vadd.f32 %v151_v2, %v150_v0  ;;  %v204_v13 = vadd.f32 %v203_v9, %v202_v8 }
 0x2c7   :  { %v186_v5 = vsel %vm185_vm4, %v165_v3, 0.0 }
 0x2c8   :  { %187 = vadd.xlane.f32.xlu0 %v186_v5  ;;  %232 = vpush %v152_v4  ;;  %v205_v16 = vrot.slane %v204_v13, 1 }
 0x2ca   :  { %v206_v19 = vadd.f32 %v205_v16, %v204_v13 }
 0x2f9   :  { %s233_s0 = spop %232 }
 0x355   :  { %v188_v10 = vpop.xlane.xlu0 %187 }
 0x356   :  { %v189_v11 = vrot.slane %v188_v10, 4 }
 0x358   :  { %v190_v12 = vadd.f32 %v189_v11, %v188_v10 }
 0x35a   :  { %v191_v14 = vrot.slane %v190_v12, 2 }
 0x35c   :  { %v192_v15 = vadd.f32 %v191_v14, %v190_v12 }
 0x35e   :  { %v193_v17 = vrot.slane %v192_v15, 1 }
 0x360   :  { %v194_v18 = vadd.f32 %v193_v17, %v192_v15 }
 0x362   :  { %234 = vpush %v194_v18 }
 0x363   :  { %236 = vpush %v206_v19 }
 0x393   :  { %s235_s1 = spop %234 }
 0x394   :  { %s196_s13 = ssub.f32 %s235_s1, %s233_s0  ;;  %s237_s14 = spop %236 }
 0x395   :  { %s208_s15 = ssub.f32 %s237_s14, %s233_s0 }
 0x397   :  { %s209_s16 = sadd.f32 %s208_s15, %s196_s13 }
 0x399   :  { %s210_s17 = smul.f32 0.5, %s209_s16 }
 0x39b   :  { %s213_s20 = smul.f32 0.5, %s210_s17 }
 0x39d   :  { %v214_v20 = vstv %s213_s20 }
 0x39e   :  { %216 = vst.msk [vmem:[#allocation2] sm:$0x1] %vm215_vm5, %v214_v20 }
 0x39f   :  { %262 = shalt.err (!%p259_p4)
}
 0x3a0   :  { %s263_s25 = scalar_lea.hbm %s322_s2, 16 }
 0x3a1   :  { %p264_p5 = scmp.ne.s32.totalorder %s322_s2, %s263_s25  ;;  %p267_p6 = scmp.lt.u32.totalorder %s263_s25, %s322_s2 }
 0x3a3   :  { %p269_p7 = pnand %p267_p6, %p264_p5 }
 0x3a5   :  { %272 = shalt.err (!%p269_p7)
}
 0x3a6   :  { %226 = dma.vmem_to_hbm [thread:$0]  %s224_s19, 16, %s322_s2, [#allocation3]  }
 0x3a7   :  { %273 = dma.done.wait [#allocation3], 16  }
 0x3a8   :  { %274 = vsyncadd [#allocation3], 4294967280 }
 0x3a9   :  { %230 = vsyncpa [#allocation3], 1 }

</bundles_post_ra>
